<compile_context>
chip_gen: v5e
topology: v5e:2x2
jax: 0.10.0
libtpu: 0.0.40
codegen_flags: <defaults>
</compile_context>

<pallas_src>
import jax
import jax.numpy as jnp
from jax.experimental import pallas as pl
from jax.experimental.pallas import tpu as pltpu


def _make_conv_relu_kernel(kh, kw, w_pad_cols, m_rows, stride, tco):
    """Builds the fused conv(+bias)+ReLU kernel for static conv geometry."""

    def kernel(x_ref, w_ref, b_ref, o_ref):
        # x_ref: (1, L, C_in)        flat row-major zero-padded NHWC image (bf16)
        # w_ref: (kh*kw, C_in, tco)  weights, C_out padded to lane-dense tco (bf16)
        # b_ref: (1, tco)            bias (f32)
        # o_ref: (1, m_rows, tco)    output rows = (h_out, w_pad) flattened
        acc = jnp.zeros((m_rows, tco), jnp.float32)
        for ki in range(kh):
            for kj in range(kw):
                start = ki * w_pad_cols + kj
                if stride == 1:
                    lhs = x_ref[0, pl.ds(start, m_rows), :]
                else:
                    lhs = x_ref[0, pl.ds(start, m_rows, stride=stride), :]
                acc = acc + jnp.dot(
                    lhs, w_ref[ki * kw + kj], preferred_element_type=jnp.float32
                )
        acc = acc + b_ref[...]  # (1, tco) broadcasts over rows
        o_ref[0] = jnp.maximum(acc, 0.0).astype(o_ref.dtype)

    return kernel


def conv_block_forward(x, weight, bias, *, stride=1, padding=1,
                       compute_dtype=jnp.bfloat16):
    """Conv2d(stride, padding) + ReLU. NCHW in / NCHW out (PyTorch semantics)."""
    N, C_in, H, W = x.shape
    C_out, C_in_w, kh, kw = weight.shape
    assert C_in_w == C_in

    H_pad, W_pad = H + 2 * padding, W + 2 * padding
    H_out = (H_pad - kh) // stride + 1
    W_out = (W_pad - kw) // stride + 1

    TCO = 128                                   # lane-dense C_out tile
    C_out_p = ((C_out + TCO - 1) // TCO) * TCO  # pad channels up to lanes

    # Compute over the padded width: rows of the GEMM index (h_out, w_pad).
    # Columns w_out..W_pad-1 are wrap-around garbage and get sliced off.
    Mp = H_out * W_pad
    start_max = (kh - 1) * W_pad + (kw - 1)
    L = max(H_pad * W_pad, start_max + stride * (Mp - 1) + 1)

    # --- boundary layout plumbing (one pass, no 9x expansion) ---
    x_nhwc = jnp.transpose(x, (0, 2, 3, 1))
    x_p = jnp.pad(x_nhwc, ((0, 0), (padding, padding), (padding, padding), (0, 0)))
    x_flat = x_p.reshape(N, H_pad * W_pad, C_in)
    if L > H_pad * W_pad:
        x_flat = jnp.pad(x_flat, ((0, 0), (0, L - H_pad * W_pad), (0, 0)))
    x_flat = x_flat.astype(compute_dtype)

    # weight (C_out, C_in, kh, kw) -> (kh*kw, C_in, C_out_p), matching kernel order
    w_r = jnp.transpose(weight, (2, 3, 1, 0)).reshape(kh * kw, C_in, C_out)
    w_r = jnp.pad(w_r, ((0, 0), (0, 0), (0, C_out_p - C_out))).astype(compute_dtype)
    b_p = jnp.pad(bias.astype(jnp.float32), (0, C_out_p - C_out)).reshape(1, C_out_p)

    kernel = _make_conv_relu_kernel(kh, kw, W_pad, Mp, stride, TCO)

    grid = (N, C_out_p // TCO)
    out = pl.pallas_call(
        kernel,
        out_shape=jax.ShapeDtypeStruct((N, Mp, C_out_p), x.dtype),
        grid_spec=pltpu.PrefetchScalarGridSpec(
            num_scalar_prefetch=0,
            grid=grid,
            in_specs=[
                # image block stays resident across the co axis (index ignores co)
                pl.BlockSpec((1, L, C_in), lambda n, co: (n, 0, 0)),
                # weights/bias stay resident across the batch axis
                pl.BlockSpec((kh * kw, C_in, TCO), lambda n, co: (0, 0, co)),
                pl.BlockSpec((1, TCO), lambda n, co: (0, co)),
            ],
            out_specs=pl.BlockSpec((1, Mp, TCO), lambda n, co: (n, 0, co)),
        ),
        compiler_params=pltpu.CompilerParams(
            dimension_semantics=("parallel", "parallel"),
            vmem_limit_bytes=48 * 1024 * 1024,
        ),
    )(x_flat, w_r, b_p)

    # (N, H_out*W_pad, C_out_p) -> NHWC (drop garbage cols / padded channels) -> NCHW
    out = out.reshape(N, H_out, W_pad, C_out_p)[:, :, :W_out, :C_out]
    return jnp.transpose(out, (0, 3, 1, 2))


if __name__ == "__main__":
    key = jax.random.PRNGKey(0)
    k_x, k_w, k_b = jax.random.split(key, 3)

    batch, in_channels, out_channels, spatial = 2, 4, 8, 16
    kh = kw = 3

    x = jax.random.normal(k_x, (batch, in_channels, spatial, spatial), jnp.float32)
    weight = jax.random.normal(k_w, (out_channels, in_channels, kh, kw), jnp.float32) * 0.1
    bias = jax.random.normal(k_b, (out_channels,), jnp.float32) * 0.1

    y = conv_block_forward(x, weight, bias, stride=1, padding=1)
    y = jax.block_until_ready(y)

    # reference: XLA conv + bias + ReLU (f32); kernel uses bf16 inputs -> looser tol
    ref = jax.lax.conv_general_dilated(
        x, weight, window_strides=(1, 1), padding=((1, 1), (1, 1)),
        dimension_numbers=("NCHW", "OIHW", "NCHW"),
    ) + bias.reshape(1, -1, 1, 1)
    ref = jnp.maximum(ref, 0.0)

    assert y.shape == (batch, out_channels, spatial, spatial)
    assert jnp.allclose(y, ref, atol=3e-2, rtol=3e-2), float(jnp.max(jnp.abs(y - ref)))

    print("KERNEL_OK")
</pallas_src>

<mosaic_0001>
module attributes {stable_mosaic.version = 11 : i64} {
  func.func @kernel(%arg0: i32, %arg1: i32, %arg2: memref<1x326x4xbf16, #tpu.memory_space<vmem>>, %arg3: memref<9x4x128xbf16, #tpu.memory_space<vmem>>, %arg4: memref<1x128xf32, #tpu.memory_space<vmem>>, %arg5: memref<1x288x128xf32, #tpu.memory_space<vmem>>) attributes {dimension_semantics = [#tpu.dimension_semantics<parallel>, #tpu.dimension_semantics<parallel>], iteration_bounds = array<i64: 2, 1>, scalar_prefetch = 0 : i64, scratch_operands = 0 : i64, tpu.core_type = #tpu.core_type<tc>, window_params = [{transform_indices = @transform_0, window_bounds = array<i64: 1, 326, 4>}, {transform_indices = @transform_1, window_bounds = array<i64: 9, 4, 128>}, {transform_indices = @transform_2, window_bounds = array<i64: 1, 128>}, {transform_indices = @transform_3, window_bounds = array<i64: 1, 288, 128>}]} {
    %cst = arith.constant 0.000000e+00 : f32
    %0 = vector.broadcast %cst : f32 to vector<288x128xf32>
    %c0 = arith.constant 0 : index
    %c0_0 = arith.constant 0 : index
    %c0_1 = arith.constant 0 : index
    %1 = vector.load %arg2[%c0, %c0_0, %c0_1] : memref<1x326x4xbf16, #tpu.memory_space<vmem>>, vector<1x288x4xbf16>
    %2 = vector.shape_cast %1 : vector<1x288x4xbf16> to vector<288x4xbf16>
    %c0_2 = arith.constant 0 : index
    %c0_3 = arith.constant 0 : index
    %c0_4 = arith.constant 0 : index
    %3 = vector.load %arg3[%c0_2, %c0_3, %c0_4] : memref<9x4x128xbf16, #tpu.memory_space<vmem>>, vector<1x4x128xbf16>
    %4 = vector.shape_cast %3 : vector<1x4x128xbf16> to vector<4x128xbf16>
    %cst_5 = arith.constant dense<0.000000e+00> : vector<288x128xf32>
    %5 = tpu.matmul %2, %4, %cst_5 {dimension_numbers = #tpu.dot_dimension_numbers<[1], [0], [0], [1], [0, 0, 1, 1], [], []>} : vector<288x4xbf16>, vector<4x128xbf16>, vector<288x128xf32> -> vector<288x128xf32>
    %6 = arith.addf %0, %5 : vector<288x128xf32>
    %c0_6 = arith.constant 0 : index
    %c1 = arith.constant 1 : index
    %c0_7 = arith.constant 0 : index
    %7 = vector.load %arg2[%c0_6, %c1, %c0_7] : memref<1x326x4xbf16, #tpu.memory_space<vmem>>, vector<1x288x4xbf16>
    %8 = vector.shape_cast %7 : vector<1x288x4xbf16> to vector<288x4xbf16>
    %c1_8 = arith.constant 1 : index
    %c0_9 = arith.constant 0 : index
    %c0_10 = arith.constant 0 : index
    %9 = vector.load %arg3[%c1_8, %c0_9, %c0_10] : memref<9x4x128xbf16, #tpu.memory_space<vmem>>, vector<1x4x128xbf16>
    %10 = vector.shape_cast %9 : vector<1x4x128xbf16> to vector<4x128xbf16>
    %cst_11 = arith.constant dense<0.000000e+00> : vector<288x128xf32>
    %11 = tpu.matmul %8, %10, %cst_11 {dimension_numbers = #tpu.dot_dimension_numbers<[1], [0], [0], [1], [0, 0, 1, 1], [], []>} : vector<288x4xbf16>, vector<4x128xbf16>, vector<288x128xf32> -> vector<288x128xf32>
    %12 = arith.addf %6, %11 : vector<288x128xf32>
    %c0_12 = arith.constant 0 : index
    %c2 = arith.constant 2 : index
    %c0_13 = arith.constant 0 : index
    %13 = vector.load %arg2[%c0_12, %c2, %c0_13] : memref<1x326x4xbf16, #tpu.memory_space<vmem>>, vector<1x288x4xbf16>
    %14 = vector.shape_cast %13 : vector<1x288x4xbf16> to vector<288x4xbf16>
    %c2_14 = arith.constant 2 : index
    %c0_15 = arith.constant 0 : index
    %c0_16 = arith.constant 0 : index
    %15 = vector.load %arg3[%c2_14, %c0_15, %c0_16] : memref<9x4x128xbf16, #tpu.memory_space<vmem>>, vector<1x4x128xbf16>
    %16 = vector.shape_cast %15 : vector<1x4x128xbf16> to vector<4x128xbf16>
    %cst_17 = arith.constant dense<0.000000e+00> : vector<288x128xf32>
    %17 = tpu.matmul %14, %16, %cst_17 {dimension_numbers = #tpu.dot_dimension_numbers<[1], [0], [0], [1], [0, 0, 1, 1], [], []>} : vector<288x4xbf16>, vector<4x128xbf16>, vector<288x128xf32> -> vector<288x128xf32>
    %18 = arith.addf %12, %17 : vector<288x128xf32>
    %c0_18 = arith.constant 0 : index
    %c18 = arith.constant 18 : index
    %c0_19 = arith.constant 0 : index
    %19 = vector.load %arg2[%c0_18, %c18, %c0_19] : memref<1x326x4xbf16, #tpu.memory_space<vmem>>, vector<1x288x4xbf16>
    %20 = vector.shape_cast %19 : vector<1x288x4xbf16> to vector<288x4xbf16>
    %c3 = arith.constant 3 : index
    %c0_20 = arith.constant 0 : index
    %c0_21 = arith.constant 0 : index
    %21 = vector.load %arg3[%c3, %c0_20, %c0_21] : memref<9x4x128xbf16, #tpu.memory_space<vmem>>, vector<1x4x128xbf16>
    %22 = vector.shape_cast %21 : vector<1x4x128xbf16> to vector<4x128xbf16>
    %cst_22 = arith.constant dense<0.000000e+00> : vector<288x128xf32>
    %23 = tpu.matmul %20, %22, %cst_22 {dimension_numbers = #tpu.dot_dimension_numbers<[1], [0], [0], [1], [0, 0, 1, 1], [], []>} : vector<288x4xbf16>, vector<4x128xbf16>, vector<288x128xf32> -> vector<288x128xf32>
    %24 = arith.addf %18, %23 : vector<288x128xf32>
    %c0_23 = arith.constant 0 : index
    %c19 = arith.constant 19 : index
    %c0_24 = arith.constant 0 : index
    %25 = vector.load %arg2[%c0_23, %c19, %c0_24] : memref<1x326x4xbf16, #tpu.memory_space<vmem>>, vector<1x288x4xbf16>
    %26 = vector.shape_cast %25 : vector<1x288x4xbf16> to vector<288x4xbf16>
    %c4 = arith.constant 4 : index
    %c0_25 = arith.constant 0 : index
    %c0_26 = arith.constant 0 : index
    %27 = vector.load %arg3[%c4, %c0_25, %c0_26] : memref<9x4x128xbf16, #tpu.memory_space<vmem>>, vector<1x4x128xbf16>
    %28 = vector.shape_cast %27 : vector<1x4x128xbf16> to vector<4x128xbf16>
    %cst_27 = arith.constant dense<0.000000e+00> : vector<288x128xf32>
    %29 = tpu.matmul %26, %28, %cst_27 {dimension_numbers = #tpu.dot_dimension_numbers<[1], [0], [0], [1], [0, 0, 1, 1], [], []>} : vector<288x4xbf16>, vector<4x128xbf16>, vector<288x128xf32> -> vector<288x128xf32>
    %30 = arith.addf %24, %29 : vector<288x128xf32>
    %c0_28 = arith.constant 0 : index
    %c20 = arith.constant 20 : index
    %c0_29 = arith.constant 0 : index
    %31 = vector.load %arg2[%c0_28, %c20, %c0_29] : memref<1x326x4xbf16, #tpu.memory_space<vmem>>, vector<1x288x4xbf16>
    %32 = vector.shape_cast %31 : vector<1x288x4xbf16> to vector<288x4xbf16>
    %c5 = arith.constant 5 : index
    %c0_30 = arith.constant 0 : index
    %c0_31 = arith.constant 0 : index
    %33 = vector.load %arg3[%c5, %c0_30, %c0_31] : memref<9x4x128xbf16, #tpu.memory_space<vmem>>, vector<1x4x128xbf16>
    %34 = vector.shape_cast %33 : vector<1x4x128xbf16> to vector<4x128xbf16>
    %cst_32 = arith.constant dense<0.000000e+00> : vector<288x128xf32>
    %35 = tpu.matmul %32, %34, %cst_32 {dimension_numbers = #tpu.dot_dimension_numbers<[1], [0], [0], [1], [0, 0, 1, 1], [], []>} : vector<288x4xbf16>, vector<4x128xbf16>, vector<288x128xf32> -> vector<288x128xf32>
    %36 = arith.addf %30, %35 : vector<288x128xf32>
    %c0_33 = arith.constant 0 : index
    %c36 = arith.constant 36 : index
    %c0_34 = arith.constant 0 : index
    %37 = vector.load %arg2[%c0_33, %c36, %c0_34] : memref<1x326x4xbf16, #tpu.memory_space<vmem>>, vector<1x288x4xbf16>
    %38 = vector.shape_cast %37 : vector<1x288x4xbf16> to vector<288x4xbf16>
    %c6 = arith.constant 6 : index
    %c0_35 = arith.constant 0 : index
    %c0_36 = arith.constant 0 : index
    %39 = vector.load %arg3[%c6, %c0_35, %c0_36] : memref<9x4x128xbf16, #tpu.memory_space<vmem>>, vector<1x4x128xbf16>
    %40 = vector.shape_cast %39 : vector<1x4x128xbf16> to vector<4x128xbf16>
    %cst_37 = arith.constant dense<0.000000e+00> : vector<288x128xf32>
    %41 = tpu.matmul %38, %40, %cst_37 {dimension_numbers = #tpu.dot_dimension_numbers<[1], [0], [0], [1], [0, 0, 1, 1], [], []>} : vector<288x4xbf16>, vector<4x128xbf16>, vector<288x128xf32> -> vector<288x128xf32>
    %42 = arith.addf %36, %41 : vector<288x128xf32>
    %c0_38 = arith.constant 0 : index
    %c37 = arith.constant 37 : index
    %c0_39 = arith.constant 0 : index
    %43 = vector.load %arg2[%c0_38, %c37, %c0_39] : memref<1x326x4xbf16, #tpu.memory_space<vmem>>, vector<1x288x4xbf16>
    %44 = vector.shape_cast %43 : vector<1x288x4xbf16> to vector<288x4xbf16>
    %c7 = arith.constant 7 : index
    %c0_40 = arith.constant 0 : index
    %c0_41 = arith.constant 0 : index
    %45 = vector.load %arg3[%c7, %c0_40, %c0_41] : memref<9x4x128xbf16, #tpu.memory_space<vmem>>, vector<1x4x128xbf16>
    %46 = vector.shape_cast %45 : vector<1x4x128xbf16> to vector<4x128xbf16>
    %cst_42 = arith.constant dense<0.000000e+00> : vector<288x128xf32>
    %47 = tpu.matmul %44, %46, %cst_42 {dimension_numbers = #tpu.dot_dimension_numbers<[1], [0], [0], [1], [0, 0, 1, 1], [], []>} : vector<288x4xbf16>, vector<4x128xbf16>, vector<288x128xf32> -> vector<288x128xf32>
    %48 = arith.addf %42, %47 : vector<288x128xf32>
    %c0_43 = arith.constant 0 : index
    %c38 = arith.constant 38 : index
    %c0_44 = arith.constant 0 : index
    %49 = vector.load %arg2[%c0_43, %c38, %c0_44] : memref<1x326x4xbf16, #tpu.memory_space<vmem>>, vector<1x288x4xbf16>
    %50 = vector.shape_cast %49 : vector<1x288x4xbf16> to vector<288x4xbf16>
    %c8 = arith.constant 8 : index
    %c0_45 = arith.constant 0 : index
    %c0_46 = arith.constant 0 : index
    %51 = vector.load %arg3[%c8, %c0_45, %c0_46] : memref<9x4x128xbf16, #tpu.memory_space<vmem>>, vector<1x4x128xbf16>
    %52 = vector.shape_cast %51 : vector<1x4x128xbf16> to vector<4x128xbf16>
    %cst_47 = arith.constant dense<0.000000e+00> : vector<288x128xf32>
    %53 = tpu.matmul %50, %52, %cst_47 {dimension_numbers = #tpu.dot_dimension_numbers<[1], [0], [0], [1], [0, 0, 1, 1], [], []>} : vector<288x4xbf16>, vector<4x128xbf16>, vector<288x128xf32> -> vector<288x128xf32>
    %54 = arith.addf %48, %53 : vector<288x128xf32>
    %c0_48 = arith.constant 0 : index
    %c0_49 = arith.constant 0 : index
    %55 = vector.load %arg4[%c0_48, %c0_49] : memref<1x128xf32, #tpu.memory_space<vmem>>, vector<1x128xf32>
    %56 = vector.broadcast %55 : vector<1x128xf32> to vector<288x128xf32>
    %57 = arith.addf %54, %56 : vector<288x128xf32>
    %cst_50 = arith.constant 0.000000e+00 : f32
    %58 = vector.broadcast %cst_50 : f32 to vector<288x128xf32>
    %59 = arith.maximumf %57, %58 : vector<288x128xf32>
    %c0_51 = arith.constant 0 : index
    %c0_52 = arith.constant 0 : index
    %c0_53 = arith.constant 0 : index
    %60 = vector.load %arg5[%c0_51, %c0_52, %c0_53] : memref<1x288x128xf32, #tpu.memory_space<vmem>>, vector<1x288x128xf32>
    %61 = vector.shape_cast %60 : vector<1x288x128xf32> to vector<288x128xf32>
    %62 = vector.shape_cast %59 : vector<288x128xf32> to vector<1x288x128xf32>
    tpu.vector_store %arg5[%c0_51, %c0_52, %c0_53], %62 {strides = array<i32>} : memref<1x288x128xf32, #tpu.memory_space<vmem>>, vector<1x288x128xf32>,
    return
  }
  func.func @transform_0(%arg0: i32, %arg1: i32) -> (i32, i32, i32) {
    %c0_i32 = arith.constant 0 : i32
    %c0_i32_0 = arith.constant 0 : i32
    %c0_i32_1 = arith.constant 0 : i32
    return %arg0, %c0_i32, %c0_i32_0 : i32, i32, i32
  }
  func.func @transform_1(%arg0: i32, %arg1: i32) -> (i32, i32, i32) {
    %c0_i32 = arith.constant 0 : i32
    %c0_i32_0 = arith.constant 0 : i32
    %c0_i32_1 = arith.constant 0 : i32
    return %c0_i32, %c0_i32_0, %arg1 : i32, i32, i32
  }
  func.func @transform_2(%arg0: i32, %arg1: i32) -> (i32, i32) {
    %c0_i32 = arith.constant 0 : i32
    %c0_i32_0 = arith.constant 0 : i32
    return %c0_i32, %arg1 : i32, i32
  }
  func.func @transform_3(%arg0: i32, %arg1: i32) -> (i32, i32, i32) {
    %c0_i32 = arith.constant 0 : i32
    %c0_i32_0 = arith.constant 0 : i32
    return %arg0, %c0_i32, %arg1 : i32, i32, i32
  }
}

</mosaic_0001>

<bundles_post_ra>
// kernel: tpu_custom_call.1
= control target key start
LH: loop header
LB: loop body
LE: loop exit
PB: predicated region body
PF: predicated region fallthrough
CT: control target
= control target key end

     0   :  { %8 = vsyncpa [#allocation3], 0  ;;  %s4964_s0 = inlined_call_operand.vmem [shape: bf16[2,326,4], index: 0, kind: input, shape index: {}]   ;;  %s4965_s1 = inlined_call_operand.vmem [shape: bf16[9,4,128], index: 1, kind: input, shape index: {}]   ;;  %s4966_s2 = inlined_call_operand.vmem [shape: f32[1,128], index: 2, kind: input, shape index: {}]   ;;  %s4967_s3 = inlined_call_operand.hbm [shape: f32[2,288,128], index: 3, kind: output, shape index: {}]  }
   0x1   :  { %10 = vsyncpa [#allocation3 + $0x1], 0  ;;  %s3819_s12 = smov 0   ;;  %s3821_s13 = smov 0  }
   0x2   :  { %s3823_s14 = smov 0   ;;  %s3825_s15 = smov 0  }
   0x3   :  { %s3827_s16 = smov 0   ;;  %s3829_s17 = smov 0  }
   0x4 LB: > { %s3189_s18 = sadd.s32 4294967295, %s3795_s17   ;;  %s3190_s19 = sadd.s32 4294967294, %s3795_s17   ;;  %s3795_s17 = sphi %s3829_s17, %s16_s17   ;;  %s3791_s16 = sphi %s3827_s16, %s4998_s16   ;;  %s3787_s15 = sphi %s3825_s15, %s4997_s15   ;;  %s3783_s14 = sphi %s3823_s14, %s4996_s14   ;;  %s3779_s13 = sphi %s3821_s13, %s4995_s13   ;;  %s3775_s12 = sphi %s3819_s12, %s4994_s12  }
   0x5   : > { %s28_s20 = sadd.s32 1, %s3791_s16  ;;  %s115_s21 = sadd.s32 1, %s3783_s14 }
   0x6   : > { %p30_p0 = scmp.ge.s32.totalorder %s28_s20, 2  ;;  %p125_p1 = scmp.ne.s32.totalorder %s3783_s14, %s3779_s13 }
   0x7   : > { %p126_p2 = scmp.eq.s32.totalorder %s3189_s18, 1  ;;  %p131_p3 = scmp.ne.s32.totalorder %s3779_s13, %s3775_s12 }
   0x8   : > { %s5000_s20 = smov (%p30_p0, %s28_s20), 0  ;;  %p132_p5 = scmp.eq.s32.totalorder %s3190_s19, 1 }
   0x9   : > { %p3859_p4 = por %p126_p2, %p125_p1  ;;  %s110_s23 = ssub.s32 %s3791_s16, %s5000_s20 }
   0xa   : > { %p3195_p6 = scmp.ge.s32.totalorder %s3795_s17, 1  ;;  %p113_p7 = scmp.eq.s32.totalorder %s110_s23, 0 }
   0xb   : > { %p3866_p8 = por %p132_p5, %p131_p3  ;;  %p171_p9 = scmp.lt.s32.totalorder %s3795_s17, 3 }
   0xc   : > { %s3872_s25 = scalar_select %p113_p7, %s3783_s14, %s115_s21  }
   0xd   : > { %p172_p10 = pnand %p3195_p6, %p171_p9 }
   0xf   : > { %175 = sbr.rel (%p172_p10) target bundleno = 830 (0x33e), region = 32 }
  0x14   : > { %v3197_v0 = vld [vmem:[%s4965_s1 + $0x2] sm:$0x3]  ;;  %vm552_vm0 = vcmask 1041408   ;;  %p202_p11 = scmp.lt.s32.totalorder %s3787_s15, 1  ;;  %v3302_v2 = vld [vmem:[%s4965_s1 + $0x4] sm:$0x3] }
  0x15   : > { %v554_v1 = vsel %vm552_vm0, %v3197_v0, 0  ;;  %v251_v3 = vld [vmem:[%s4965_s1] sm:$0x3]  ;;  %v892_v4 = vsel %vm552_vm0, %v3302_v2, 0  ;;  %v3408_v6 = vld [vmem:[%s4965_s1 + $0x8] sm:$0x3] }
  0x16   : > { %3632 = vmatpush.bf16.msra.mxu1 %v554_v1  ;;  %3633 = vmatpush.bf16.msra.mxu2 %v554_v1  ;;  %s203_s5 = scalar_select %p202_p11, %s3787_s15, 1  ;;  %v692_v5 = vsel %vm552_vm0, %v251_v3, 0  ;;  %v1622_v7 = vsel %vm552_vm0, %v3408_v6, 0  ;;  %vm348_vm1 = vsmask.f32 7424  ;;  %vm497_vm2 = vcmask 31744  }
  0x17   : > { %563 = vmatpush.bf16.msra.mxu0 %v554_v1  ;;  %3634 = vmatpush.bf16.msra.mxu3 %v554_v1  ;;  %v3321_v45 = vld [vmem:[%s4965_s1 + $0x6] sm:$0x3]  ;;  %vm799_vm3 = vcmask 1046528   ;;  %vm1396_vm4 = vsmask.f32 6400  ;;  %vm1765_vm6 = vcmask 1045504  }
  0x18   : > { %s3636_s8 = smul.u32 164, %s203_s5  ;;  %v1253_v53 = vsel %vm552_vm0, %v3321_v45, 0  ;;  %vm2362_vm5 = vsmask.f32 5376  ;;  %vm2731_vm7 = vcmask 1044480   ;;  %s199_s5 = sand.u32 1, %s3779_s13  }
  0x19   : > { %s3637_s10 = smul.u32 288, %s3787_s15  ;;  %s3074_s27 = scalar_lea.sflag [#allocation3], %s199_s5 }
  0x1a   : > { %901 = vmatpush.bf16.msrb.mxu2 %v892_v4  ;;  %701 = vmatpush.bf16.msrb.mxu1 %v692_v5  ;;  %s3895_s11 = scalar_lea.vmem %s4964_s0, %s3636_s8  ;;  %s3635_s8 = smul.u32 288, %s199_s5 }
  0x1b   : > { %1631 = vmatpush.bf16.msrb.mxu0 %v1622_v7  ;;  %v3898_v8 = vld [vmem:[%s3895_s11 + $0x28] sm:$0xff]  ;;  %v3901_v9 = vld [vmem:[%s3895_s11 + $0x30] sm:$0xff]  ;;  %v3907_v11 = vld [vmem:[%s3895_s11 + $0x58] sm:$0xff]  ;;  %1262 = vmatpush.bf16.msrb.mxu3 %v1253_v53  ;;  %s3086_s23 = scalar_lea.hbm %s4967_s3, %s3637_s10  ;;  %s3737_s6 = scalar_lea.hbm %s4967_s3, 576 }
  0x1c   : > { %v3904_v10 = vld [vmem:[%s3895_s11 + $0x50] sm:$0xff]  ;;  %v3910_v12 = vld [vmem:[%s3895_s11] sm:$0xff]   ;;  %v3913_v13 = vld [vmem:[%s3895_s11 + $0x8] sm:$0xff]  ;;  %v389_v14 = vshll.u32 %v3898_v8, 16  ;;  %v393_v15 = vshrl.u32 %v3898_v8, 16  ;;  %v397_v16 = vshll.u32 %v3901_v9, 16 }
  0x1d   : > { %v429_v17 = vshll.u32 %v3904_v10, 16  ;;  %v433_v18 = vshrl.u32 %v3904_v10, 16  ;;  %v437_v19 = vshll.u32 %v3907_v11, 16  ;;  %v350_v20 = vshrl.u32 %v3910_v12, 16  ;;  %v3931_v31 = vld [vmem:[%s3895_s11 + $0x78] sm:$0xff]  ;;  %v3589_v32 = vld [vmem:[%s3895_s11 + $0x80] sm:$0xff] }
  0x1e   : > { %v352_v21 = vshll.u32 %v3910_v12, 16  ;;  %v3923_v22 = vrot.slane %v389_v14, 1  ;;  %v399_v23 = vrot.slane %v397_v16, 1  ;;  %v357_v25 = vshll.u32 %v3913_v13, 16  ;;  %v3940_v37 = vld [vmem:[%s3895_s11 + $0x38] sm:$0xff]  ;;  %v3944_v38 = vld [vmem:[%s3895_s11 + $0x60] sm:$0xff] }
  0x1f   : > { %v3925_v24 = vrot.slane %v429_v17, 1  ;;  %v439_v26 = vrot.slane %v437_v19, 1  ;;  %v469_v39 = vshll.u32 %v3931_v31, 16  ;;  %v473_v40 = vshrl.u32 %v3931_v31, 16  ;;  %v3949_v42 = vld [vmem:[%s3895_s11 + $0x10] sm:$0xff]  ;;  %v3590_v59 = vld [vmem:[%s3895_s11 + $0x88] sm:$0xff] }
  0x20   : > { %v354_v27 = vrot.slane %v352_v21, 1  ;;  %v395_v28 = vor.u32 %v393_v15, %v3923_v22  ;;  %v359_v30 = vrot.slane %v357_v25, 1  ;;  %v477_v41 = vshll.u32 %v3589_v32, 16  ;;  %v3968_v60 = vld [vmem:[%s3895_s11 + $0x48] sm:$0xff]  ;;  %v3977_v5 = vld [vmem:[%s3895_s11 + $0x40] sm:$0xff]  ;;  %v3985_v17 = vld [vmem:[%s3895_s11 + $0x18] sm:$0xff] }
  0x21   : > { %v435_v29 = vor.u32 %v433_v18, %v3925_v24  ;;  %v3951_v43 = vrot.slane %v469_v39, 1  ;;  %v401_v46 = vshrl.u32 %v3901_v9, 16  ;;  %v405_v47 = vshll.u32 %v3940_v37, 16  ;;  %v3980_v6 = vld [vmem:[%s3895_s11 + $0x68] sm:$0xff]  ;;  %v252_v18 = vld [vmem:[%s3895_s11 + $0x90] sm:$0x1] }
  0x22   : > { %v355_v33 = vor.u32 %v354_v27, %v350_v20  ;;  %v400_v34 = vsel %vm348_vm1, %v395_v28, %v399_v23  ;;  %v479_v44 = vrot.slane %v477_v41, 1  ;;  %v441_v48 = vshrl.u32 %v3907_v11, 16  ;;  %v3994_v27 = vld [vmem:[%s3895_s11 + $0x20] sm:$0xff]  ;;  %s4660_s9 = scalar_lea.vmem [#allocation2], %s3635_s8  ;;  %s3089_s26 = sshll.u32 %s3086_s23, 4  ;;  %s3090_s26 = int_to_ptr.hbm [resolvable:$true] %s3089_s26 }
  0x23   : > { %v440_v35 = vsel %vm348_vm1, %v435_v29, %v439_v26  ;;  %3271 = vmatmul.msk.bf16.vlgmr.msra.gmra.mxu1 %vm497_vm2, %v400_v34  ;;  %v445_v49 = vshll.u32 %v3944_v38, 16  ;;  %v475_v50 = vor.u32 %v473_v40, %v3951_v43  ;;  %v361_v51 = vshrl.u32 %v3913_v13, 16  ;;  %s3087_s15 = sshll.u32 %s4660_s9, 4  ;;  %s3731_s28 = sshra.s32 %s3090_s26, 4  ;;  %s3088_s15 = int_to_ptr.vmem [resolvable:$true] %s3087_s15  ;;  %s3732_s28 = int_to_ptr.hbm [resolvable:$true] %s3731_s28 }
  0x24   : > { %3276 = vmatmul.msk.bf16.vlgmr.msra.gmra.mxu2 %vm497_vm2, %v440_v35  ;;  %v360_v36 = vsel %vm348_vm1, %v355_v33, %v359_v30  ;;  %v365_v52 = vshll.u32 %v3949_v42, 16  ;;  %v403_v55 = vor.u32 %v401_v46, %v399_v23  ;;  %v407_v56 = vrot.slane %v405_v47, 1  ;;  %s3733_s29 = scalar_lea.hbm %s3732_s28, 288  ;;  %p3738_p1 = scmp.lt.s32.totalorder %s3732_s28, %s4967_s3 }
  0x25   : > { %3266 = vmatmul.msk.bf16.vlgmr.msra.gmra.mxu0 %vm497_vm2, %v360_v36  ;;  %v480_v54 = vsel %vm348_vm1, %v475_v50, %v479_v44  ;;  %v443_v57 = vor.u32 %v441_v48, %v439_v26  ;;  %v447_v58 = vrot.slane %v445_v49, 1  ;;  %v363_v61 = vor.u32 %v361_v51, %v359_v30  ;;  %p3734_p12 = scmp.ne.s32.totalorder %s3732_s28, %s3733_s29  ;;  %p3739_p2 = scmp.lt.s32.totalorder %s3737_s6, %s3733_s29 }
  0x26   : > { %3281 = vmatmul.msk.bf16.vlgmr.msra.gmra.mxu3 %vm497_vm2, %v480_v54  ;;  %v367_v62 = vrot.slane %v365_v52, 1  ;;  %v408_v63 = vsel %vm348_vm1, %v403_v55, %v407_v56  ;;  %v481_v1 = vshrl.u32 %v3589_v32, 16  ;;  %v485_v2 = vshll.u32 %v3590_v59, 16  ;;  %v4015_v52 = vld [vmem:[%s3895_s11 + $0x70] sm:$0xff] }
  0x27   : > { %v448_v0 = vsel %vm348_vm1, %v443_v57, %v447_v58  ;;  %v421_v3 = vshll.u32 %v3968_v60, 16  ;;  %v425_v16 = vshrl.u32 %v3968_v60, 16  ;;  %v409_v20 = vshrl.u32 %v3940_v37, 16  ;;  %p3735_p13 = pnand %p3734_p12, %p3859_p4  ;;  %p3740_p3 = por %p3739_p2, %p3738_p1 }
  0x28   : > { %v368_v4 = vsel %vm348_vm1, %v363_v61, %v367_v62  ;;  %v483_v7 = vor.u32 %v481_v1, %v479_v44  ;;  %v487_v14 = vrot.slane %v485_v2, 1  ;;  %v413_v21 = vshll.u32 %v3977_v5, 16 }
  0x29   : > { %v423_v15 = vrot.slane %v421_v3, 1  ;;  %v449_v23 = vshrl.u32 %v3944_v38, 16  ;;  %v453_v25 = vshll.u32 %v3980_v6, 16  ;;  %v328_v28 = vunpack.c.l.b16 %v252_v18  ;;  %p3736_p0 = pneg %p3735_p13 }
  0x2a   : > { %v488_v26 = vsel %vm348_vm1, %v483_v7, %v487_v14  ;;  %v369_v30 = vshrl.u32 %v3949_v42, 16  ;;  %v373_v32 = vshll.u32 %v3985_v17, 16  ;;  %v411_v33 = vor.u32 %v409_v20, %v407_v56  ;;  %v3591_v7 = vld [vmem:[%s3895_s11 + $0x10] sm:$0xff] }
  0x2b   : > { %v427_v19 = vor.u32 %v425_v16, %v423_v15  ;;  %v415_v34 = vrot.slane %v413_v21, 1  ;;  %v451_v35 = vor.u32 %v449_v23, %v447_v58  ;;  %v455_v36 = vrot.slane %v453_v25, 1  ;;  %v3446_v21 = vld [vmem:[%s4965_s1 + $0xc] sm:$0x3]  ;;  %v3533_v25 = vld [vmem:[%s4965_s1 + $0xe] sm:$0x3]  ;;  %p3741_p5 = pnand %p3740_p3, %p3736_p0 }
  0x2c   : > { %v381_v39 = vshll.u32 %v3994_v27, 16  ;;  %v4004_v40 = vpack.c.b16 %v328_v28, %v328_v28  ;;  %v371_v41 = vor.u32 %v369_v30, %v367_v62  ;;  %v375_v44 = vrot.slane %v373_v32, 1  ;;  %v1029_v62 = vld [vmem:[%s3895_s11 + $0x8] sm:$0xe]  ;;  %v3552_v32 = vld [vmem:[%s4965_s1 + $0x10] sm:$0x3] }
  0x2d   : > { %v3998_v29 = vsel %vm348_vm1, %v427_v19, %v3925_v24  ;;  %v416_v24 = vsel %vm348_vm1, %v411_v33, %v415_v34  ;;  %v456_v45 = vsel %vm348_vm1, %v451_v35, %v455_v36  ;;  %v489_v47 = vshrl.u32 %v3590_v59, 16 }
  0x2e   : > { %v383_v46 = vrot.slane %v381_v39, 1  ;;  %v493_v48 = vshll.u32 %v4004_v40, 16  ;;  %v385_v49 = vshrl.u32 %v3994_v27, 16  ;;  %v376_v50 = vsel %vm348_vm1, %v371_v41, %v375_v44  ;;  %v3592_v41 = vld [vmem:[%s3895_s11 + $0x18] sm:$0xff] }
  0x2f   : > { %v491_v53 = vor.u32 %v489_v47, %v487_v14  ;;  %v417_v56 = vshrl.u32 %v3977_v5, 16  ;;  %v457_v57 = vshrl.u32 %v3980_v6, 16  ;;  %v461_v58 = vshll.u32 %v4015_v52, 16 }
  0x30   : > { %v387_v51 = vor.u32 %v385_v49, %v383_v46  ;;  %v495_v54 = vrot.slane %v493_v48, 1  ;;  %v377_v61 = vshrl.u32 %v3985_v17, 16  ;;  %v1105_v3 = vunpack.c.l.b16 %v1029_v62 }
  0x31   : > { %v459_v1 = vor.u32 %v457_v57, %v455_v36  ;;  %v463_v2 = vrot.slane %v461_v58, 1  ;;  %v1162_v20 = vrot.slane %v3591_v7, 1  ;;  %v2588_v28 = vsel %vm552_vm0, %v3533_v25, 0 }
  0x32   : > { %v392_v55 = vsel %vm348_vm1, %v387_v51, %v3923_v22  ;;  %v496_v59 = vsel %vm348_vm1, %v491_v53, %v495_v54  ;;  %2597 = vmatpush.bf16.msra.mxu3 %v2588_v28  ;;  %v2824_v33 = vsel %vm552_vm0, %v3552_v32, 0  ;;  %v1406_v48 = vshrl.u32 %v3591_v7, 16 }
  0x33   : > { %3272 = vmatmul.msk.bf16.gmra.mxu1 %vm497_vm2, %v408_v63  ;;  %v4026_v63 = vld [vmem:[%s3895_s11 + $0xc] sm:$0xf]  ;;  %v464_v16 = vsel %vm348_vm1, %v459_v1, %v463_v2  ;;  %2833 = vmatpush.bf16.msra.mxu0 %v2824_v33  ;;  %v1409_v49 = vshll.u32 %v3591_v7, 16  ;;  %v1415_v1 = vshrl.u32 %v3592_v41, 16  ;;  %v805_v28 = vrot.slane %v3985_v17, 1  ;;  %v3595_v33 = vld [vmem:[%s3895_s11 + $0x30] sm:$0xff] }
  0x34   : > { %3277 = vmatmul.msk.bf16.gmra.mxu2 %vm497_vm2, %v448_v0  ;;  %v419_v0 = vor.u32 %v417_v56, %v415_v34  ;;  %v4968_v22 = vunpack.c.l.b16 %v4026_v63  ;;  %v465_v34 = vshrl.u32 %v4015_v52, 16  ;;  %v1408_v54 = vrot.slane %v1406_v48, 1 }
  0x35   : > { %3267 = vmatmul.msk.bf16.gmra.mxu0 %vm497_vm2, %v368_v4  ;;  %v379_v4 = vor.u32 %v377_v61, %v375_v44  ;;  %v3629_v44 = vld [vmem:[%s3895_s11] sm:$0xf0]  ;;  %v1411_v56 = vrot.slane %v1409_v49, 2 }
  0x36   : > { %3282 = vmatmul.msk.bf16.gmra.mxu3 %vm497_vm2, %v488_v26  ;;  %v424_v14 = vsel %vm348_vm1, %v419_v0, %v423_v15  ;;  %v1142_v18 = vpack.c.b16 %v4968_v22, %v1105_v3  ;;  %v2219_v15 = vsel %vm552_vm0, %v3446_v21, 0  ;;  %v3427_v26 = vld [vmem:[%s4965_s1 + $0xa] sm:$0x3]  ;;  %v467_v36 = vor.u32 %v465_v34, %v463_v2  ;;  %v3593_v61 = vld [vmem:[%s3895_s11 + $0x20] sm:$0xff] }
  0x37   : > { %v384_v19 = vsel %vm348_vm1, %v379_v4, %v383_v46  ;;  %2228 = vmatpush.bf16.msra.mxu2 %v2219_v15  ;;  %v1858_v30 = vsel %vm552_vm0, %v3427_v26, 0  ;;  %v1412_v58 = vor.u32 %v1411_v56, %v1408_v54  ;;  %v1166_v0 = vrot.slane %v3593_v61, 1  ;;  %v3601_v22 = vld [vmem:[%s3895_s11 + $0x60] sm:$0xff] }
  0x38   : > { %v1161_v23 = vrot.slane %v1142_v18, 1  ;;  %1867 = vmatpush.bf16.msra.mxu1 %v1858_v30  ;;  %v472_v39 = vsel %vm348_vm1, %v467_v36, %v3951_v43  ;;  %v1398_v46 = vshrl.u32 %v1142_v18, 16  ;;  %v1401_v47 = vshll.u32 %v1142_v18, 16 }
  0x39   : > { %v1418_v2 = vshll.u32 %v3592_v41, 16  ;;  %v1417_v4 = vrot.slane %v1415_v1, 1  ;;  %v1424_v21 = vshrl.u32 %v3593_v61, 16  ;;  %v1170_v34 = vrot.slane %v3595_v33, 1  ;;  %v3597_v1 = vld [vmem:[%s3895_s11 + $0x40] sm:$0xff] }
  0x3a   : > { %v1163_v35 = vsel %vm799_vm3, %v1161_v23, %v1162_v20  ;;  %v1400_v43 = vrot.slane %v1398_v46, 1  ;;  %v1403_v53 = vrot.slane %v1401_v47, 2  ;;  %v1427_v23 = vshll.u32 %v3593_v61, 16  ;;  %v3596_v47 = vld [vmem:[%s3895_s11 + $0x38] sm:$0xff] }
  0x3b   : > { %v1420_v7 = vrot.slane %v1418_v2, 2  ;;  %v1426_v25 = vrot.slane %v1424_v21, 1 }
  0x3c   : > { %v1404_v57 = vor.u32 %v1403_v53, %v1400_v43  ;;  %v1429_v26 = vrot.slane %v1427_v23, 2  ;;  %v1445_v43 = vshll.u32 %v3595_v33, 16  ;;  %v811_v23 = vrot.slane %v3901_v9, 1 }
  0x3e   : > { %v1413_v62 = vsel %vm1396_vm4, %v1404_v57, %v1412_v58  ;;  %v1430_v30 = vor.u32 %v1429_v26, %v1426_v25  ;;  %v1447_v57 = vrot.slane %v1445_v43, 2 }
  0x43   : > { %3273 = vmatmul.msk.bf16.gmra.mxu1 %vm497_vm2, %v416_v24  ;;  %v1164_v24 = vrot.slane %v3592_v41, 1 }
  0x44   : > { %3278 = vmatmul.msk.bf16.gmra.mxu2 %vm497_vm2, %v456_v45  ;;  %v3630_v45 = vld [vmem:[%s3895_s11] sm:$0xe] }
  0x45   : > { %3268 = vmatmul.msk.bf16.gmra.mxu0 %vm497_vm2, %v376_v50  ;;  %v3631_v50 = vor.u32 %v3630_v45, %v3629_v44  ;;  %v1165_v51 = vsel %vm799_vm3, %v1162_v20, %v1164_v24  ;;  %v1167_v3 = vsel %vm799_vm3, %v1164_v24, %v1166_v0  ;;  %v807_v24 = vrot.slane %v3994_v27, 1 }
  0x46   : > { %3283 = vmatmul.msk.bf16.gmra.mxu3 %vm497_vm2, %v496_v59 }
  0x53   : > { %3274 = vmatmul.msk.bf16.gmra.mxu1 %vm497_vm2, %v424_v14  ;;  %v803_v14 = vrot.slane %v3949_v42, 1 }
  0x54   : > { %3279 = vmatmul.msk.bf16.gmra.mxu2 %vm497_vm2, %v464_v16  ;;  %v1421_v16 = vor.u32 %v1420_v7, %v1417_v4  ;;  %v1174_v4 = vrot.slane %v3597_v1, 1  ;;  %v1451_v7 = vshrl.u32 %v3596_v47, 16 }
  0x55   : > { %3269 = vmatmul.msk.bf16.gmra.mxu0 %vm497_vm2, %v384_v19  ;;  %v806_v32 = vsel %vm799_vm3, %v803_v14, %v805_v28 }
  0x56   : > { %3390 = vmatmul.msk.bf16.vlgmr.msrb.gmra.mxu3 %vm497_vm2, %v1163_v35  ;;  %v1422_v19 = vsel %vm1396_vm4, %v1412_v58, %v1421_v16  ;;  %v1453_v21 = vrot.slane %v1451_v7, 1 }
  0x63   : > { %3275 = vmatmul.msk.bf16.gmra.mxu1 %vm497_vm2, %v3998_v29  ;;  %v800_v29 = vrot.slane %v3631_v50, 1  ;;  %v1172_v50 = vrot.slane %v3596_v47, 1 }
  0x64   : > { %3280 = vmatmul.msk.bf16.gmra.mxu2 %vm497_vm2, %v472_v39 }
  0x65   : > { %3270 = vmatmul.msk.bf16.gmra.mxu0 %vm497_vm2, %v392_v55  ;;  %v801_v55 = vrot.slane %v3913_v13, 1  ;;  %v1173_v56 = vsel %vm799_vm3, %v1170_v34, %v1172_v50 }
  0x66   : > { %3391 = vmatmul.msk.bf16.gmra.mxu3 %vm497_vm2, %v1165_v51  ;;  %v1442_v51 = vshrl.u32 %v3595_v33, 16 }
  0x67   : > { %v802_v59 = vsel %vm799_vm3, %v800_v29, %v801_v55  ;;  %v804_v18 = vsel %vm799_vm3, %v801_v55, %v803_v14  ;;  %v1454_v14 = vshll.u32 %v3596_v47, 16  ;;  %v813_v47 = vrot.slane %v3940_v37, 1 }
  0x68   : > { %v1444_v55 = vrot.slane %v1442_v51, 1 }
  0x6a   : > { %v1448_v58 = vor.u32 %v1447_v57, %v1444_v55  ;;  %v3599_v55 = vld [vmem:[%s3895_s11 + $0x50] sm:$0xff] }
  0x73   : > { %3284 = vmatmul.msk.bf16.vlgmr.msrb.gmra.mxu1 %vm497_vm2, %v3910_v12  ;;  %v3594_v12 = vld [vmem:[%s3895_s11 + $0x28] sm:$0xff] }
  0x74   : > { %3303 = vmatmul.msk.bf16.vlgmr.msrb.gmra.mxu2 %vm497_vm2, %v802_v59  ;;  %v1168_v20 = vrot.slane %v3594_v12, 1  ;;  %v1433_v35 = vshrl.u32 %v3594_v12, 16  ;;  %v1436_v36 = vshll.u32 %v3594_v12, 16 }
  0x75   : > { %3409 = vmatmul.msk.bf16.vlgmr.msrb.gmra.mxu0 %vm497_vm2, %v1413_v62 }
  0x76   : > { %3392 = vmatmul.msk.bf16.gmra.mxu3 %vm497_vm2, %v1167_v3  ;;  %v1169_v15 = vsel %vm799_vm3, %v1166_v0, %v1168_v20  ;;  %v1171_v39 = vsel %vm799_vm3, %v1168_v20, %v1170_v34  ;;  %v1435_v41 = vrot.slane %v1433_v35, 1  ;;  %v1438_v44 = vrot.slane %v1436_v36, 2 }
  0x77   : > { %v1460_v35 = vshrl.u32 %v3597_v1, 16  ;;  %v1463_v36 = vshll.u32 %v3597_v1, 16 }
  0x78   : > { %v1439_v45 = vor.u32 %v1438_v44, %v1435_v41 }
  0x7a   : > { %v1440_v49 = vsel %vm1396_vm4, %v1430_v30, %v1439_v45  ;;  %v1449_v3 = vsel %vm1396_vm4, %v1439_v45, %v1448_v58 }
  0x83   : > { %3285 = vmatmul.msk.bf16.gmra.mxu1 %vm497_vm2, %v3913_v13  ;;  %v1431_v13 = vsel %vm1396_vm4, %v1421_v16, %v1430_v30 }
  0x84   : > { %3304 = vmatmul.msk.bf16.gmra.mxu2 %vm497_vm2, %v804_v18 }
  0x85   : > { %3410 = vmatmul.msk.bf16.gmra.mxu0 %vm497_vm2, %v1422_v19  ;;  %v1175_v19 = vsel %vm799_vm3, %v1172_v50, %v1174_v4 }
  0x86   : > { %3393 = vmatmul.msk.bf16.gmra.mxu3 %vm497_vm2, %v1169_v15 }
  0x93   : > { %3286 = vmatmul.msk.bf16.gmra.mxu1 %vm497_vm2, %v3949_v42  ;;  %v808_v42 = vsel %vm799_vm3, %v805_v28, %v807_v24 }
  0x94   : > { %3305 = vmatmul.msk.bf16.gmra.mxu2 %vm497_vm2, %v806_v32  ;;  %v3598_v32 = vld [vmem:[%s3895_s11 + $0x48] sm:$0xff] }
  0x95   : > { %3411 = vmatmul.msk.bf16.gmra.mxu0 %vm497_vm2, %v1431_v13  ;;  %v1176_v34 = vrot.slane %v3598_v32, 1  ;;  %v1472_v1 = vshll.u32 %v3598_v32, 16 }
  0x96   : > { %3394 = vmatmul.msk.bf16.gmra.mxu3 %vm497_vm2, %v1171_v39 }
  0xa0   : > { %v4100_v46 = vpop.f32.mrf.mxu1 }
  0xa2   : > { %v4104_v48 = vpop.f32.mrf.mxu0 }
  0xa3   : > { %3287 = vmatmul.msk.bf16.gmra.mxu1 %vm497_vm2, %v3985_v17  ;;  %v809_v17 = vrot.slane %v3898_v8, 1 }
  0xa4   : > { %3306 = vmatmul.msk.bf16.gmra.mxu2 %vm497_vm2, %v808_v42  ;;  %v1462_v42 = vrot.slane %v1460_v35, 1  ;;  %v3600_v35 = vld [vmem:[%s3895_s11 + $0x58] sm:$0xff] }
  0xa5   : > { %3412 = vmatmul.msk.bf16.gmra.mxu0 %vm497_vm2, %v1440_v49  ;;  %v810_v0 = vsel %vm799_vm3, %v807_v24, %v809_v17  ;;  %v812_v30 = vsel %vm799_vm3, %v809_v17, %v811_v23  ;;  %v1177_v24 = vsel %vm799_vm3, %v1174_v4, %v1176_v34 }
  0xa6   : > { %3395 = vmatmul.msk.bf16.gmra.mxu3 %vm497_vm2, %v1173_v56  ;;  %v814_v56 = vsel %vm799_vm3, %v811_v23, %v813_v47 }
  0xa7   : > { %v4111_v53 = vpop.f32.mrf.mxu2 }
  0xa8   : > { %v4113_v54 = vpop.f32.mrf.mxu1 }
  0xa9   : > { %v4122_v61 = vpop.f32.mrf.mxu3 }
  0xaa   : > { %v4116_v29 = vpop.f32.mrf.mxu0  ;;  %4972 = vst [vmem:[#allocation5_spill] sm:$0xff] %v4122_v61 }
  0xaf   : > { %v4120_v59 = vpop.f32.mrf.mxu2 }
  0xb0   : > { %v4124_v62 = vpop.f32.mrf.mxu1 }
  0xb1   : > { %v4137_v18 = vpop.f32.mrf.mxu3 }
  0xb2   : > { %v4128_v2 = vpop.f32.mrf.mxu0  ;;  %4973 = vst [vmem:[#allocation6_spill] sm:$0xff] %v4137_v18 }
  0xb3   : > { %3288 = vmatmul.msk.bf16.gmra.mxu1 %vm497_vm2, %v3994_v27  ;;  %v1456_v27 = vrot.slane %v1454_v14, 2 }
  0xb4   : > { %3307 = vmatmul.msk.bf16.gmra.mxu2 %vm497_vm2, %v810_v0  ;;  %v1469_v0 = vshrl.u32 %v3598_v32, 16 }
  0xb5   : > { %3413 = vmatmul.msk.bf16.gmra.mxu0 %vm497_vm2, %v1449_v3  ;;  %v1457_v15 = vor.u32 %v1456_v27, %v1453_v21  ;;  %v815_v27 = vrot.slane %v3977_v5, 1 }
  0xb6   : > { %3396 = vmatmul.msk.bf16.gmra.mxu3 %vm497_vm2, %v1175_v19  ;;  %v1471_v21 = vrot.slane %v1469_v0, 1 }
  0xb7   : > { %v4135_v16 = vpop.f32.mrf.mxu2  ;;  %v1458_v13 = vsel %vm1396_vm4, %v1448_v58, %v1457_v15  ;;  %v1178_v58 = vrot.slane %v3599_v55, 1 }
  0xb8   : > { %v4139_v12 = vpop.f32.mrf.mxu1 }
  0xb9   : > { %v4148_v26 = vpop.f32.mrf.mxu3  ;;  %v1179_v14 = vsel %vm799_vm3, %v1176_v34, %v1178_v58 }
  0xba   : > { %v4142_v20 = vpop.f32.mrf.mxu0  ;;  %4974 = vst [vmem:[#allocation7_spill] sm:$0xff] %v4148_v26 }
  0xbf   : > { %v4146_v25 = vpop.f32.mrf.mxu2 }
  0xc0   : > { %v4150_v28 = vpop.f32.mrf.mxu1 }
  0xc1   : > { %v4163_v41 = vpop.f32.mrf.mxu3 }
  0xc2   : > { %v4154_v33 = vpop.f32.mrf.mxu0  ;;  %4975 = vst [vmem:[#allocation8_spill] sm:$0xff] %v4163_v41 }
  0xc3   : > { %3289 = vmatmul.msk.bf16.gmra.mxu1 %vm497_vm2, %v3898_v8  ;;  %v1465_v8 = vrot.slane %v1463_v36, 2 }
  0xc4   : > { %3308 = vmatmul.msk.bf16.gmra.mxu2 %vm497_vm2, %v812_v30 }
  0xc5   : > { %3414 = vmatmul.msk.bf16.gmra.mxu0 %vm497_vm2, %v1458_v13  ;;  %v1466_v49 = vor.u32 %v1465_v8, %v1462_v42  ;;  %v816_v13 = vsel %vm799_vm3, %v813_v47, %v815_v27  ;;  %v1478_v42 = vshrl.u32 %v3599_v55, 16  ;;  %v1481_v8 = vshll.u32 %v3599_v55, 16 }
  0xc6   : > { %3397 = vmatmul.msk.bf16.gmra.mxu3 %vm497_vm2, %v1177_v24  ;;  %v1180_v24 = vrot.slane %v3600_v35, 1 }
  0xc7   : > { %v4161_v39 = vpop.f32.mrf.mxu2  ;;  %v1467_v17 = vsel %vm1396_vm4, %v1457_v15, %v1466_v49 }
  0xc8   : > { %v4165_v44 = vpop.f32.mrf.mxu1  ;;  %v1181_v0 = vsel %vm799_vm3, %v1178_v58, %v1180_v24  ;;  %v1182_v58 = vrot.slane %v3601_v22, 1 }
  0xc9   : > { %v4174_v51 = vpop.f32.mrf.mxu3 }
  0xca   : > { %v4168_v45 = vpop.f32.mrf.mxu0  ;;  %4976 = vst [vmem:[#allocation9_spill] sm:$0xff] %v4174_v51  ;;  %v1183_v26 = vsel %vm799_vm3, %v1180_v24, %v1182_v58  ;;  %v3602_v24 = vld [vmem:[%s3895_s11 + $0x68] sm:$0xff] }
  0xcf   : > { %v4172_v50 = vpop.f32.mrf.mxu2 }
  0xd0   : > { %v4176_v43 = vpop.f32.mrf.mxu1 }
  0xd1   : > { %v4189_v4 = vpop.f32.mrf.mxu3 }
  0xd2   : > { %v4180_v57 = vpop.f32.mrf.mxu0  ;;  %4977 = vst [vmem:[#allocation10_spill] sm:$0xff] %v4189_v4 }
  0xd3   : > { %3290 = vmatmul.msk.bf16.gmra.mxu1 %vm497_vm2, %v3901_v9  ;;  %v1474_v9 = vrot.slane %v1472_v1, 2 }
  0xd4   : > { %3309 = vmatmul.msk.bf16.gmra.mxu2 %vm497_vm2, %v814_v56 }
  0xd5   : > { %3415 = vmatmul.msk.bf16.gmra.mxu0 %vm497_vm2, %v1467_v17  ;;  %v1475_v23 = vor.u32 %v1474_v9, %v1471_v21 }
  0xd6   : > { %3398 = vmatmul.msk.bf16.gmra.mxu3 %vm497_vm2, %v1179_v14  ;;  %v1483_v14 = vrot.slane %v1481_v8, 2  ;;  %v1487_v8 = vshrl.u32 %v3600_v35, 16 }
  0xd7   : > { %v4187_v3 = vpop.f32.mrf.mxu2  ;;  %v1476_v34 = vsel %vm1396_vm4, %v1466_v49, %v1475_v23  ;;  %v1480_v49 = vrot.slane %v1478_v42, 1 }
  0xd8   : > { %v4191_v7 = vpop.f32.mrf.mxu1  ;;  %v1489_v61 = vrot.slane %v1487_v8, 1 }
  0xd9   : > { %v1264_v30 = vpop.f32.mrf.mxu3  ;;  %v1484_v21 = vor.u32 %v1483_v14, %v1480_v49 }
  0xda   : > { %v4194_v19 = vpop.f32.mrf.mxu0 }
  0xdb   : > { %v1485_v51 = vsel %vm1396_vm4, %v1475_v23, %v1484_v21 }
  0xdf   : > { %v4198_v15 = vpop.f32.mrf.mxu2 }
  0xe0   : > { %v4200_v32 = vpop.f32.mrf.mxu1 }
  0xe1   : > { %v1266_v17 = vpop.f32.mrf.mxu3 }
  0xe2   : > { %v4204_v36 = vpop.f32.mrf.mxu0 }
  0xe3   : > { %3291 = vmatmul.msk.bf16.gmra.mxu1 %vm497_vm2, %v3940_v37  ;;  %v817_v37 = vrot.slane %v3968_v60, 1 }
  0xe4   : > { %3310 = vmatmul.msk.bf16.gmra.mxu2 %vm497_vm2, %v816_v13 }
  0xe5   : > { %3416 = vmatmul.msk.bf16.gmra.mxu0 %vm497_vm2, %v1476_v34  ;;  %v818_v34 = vsel %vm799_vm3, %v815_v27, %v817_v37 }
  0xe6   : > { %3399 = vmatmul.msk.bf16.gmra.mxu3 %vm497_vm2, %v1181_v0  ;;  %v1490_v0 = vshll.u32 %v3600_v35, 16 }
  0xe7   : > { %v4211_v56 = vpop.f32.mrf.mxu2 }
  0xe8   : > { %4978 = vst [vmem:[#allocation11_spill] sm:$0xff] %v4211_v56  ;;  %v4213_v47 = vpop.f32.mrf.mxu1 }
  0xe9   : > { %v1269_v13 = vpop.f32.mrf.mxu3 }
  0xea   : > { %v4216_v1 = vpop.f32.mrf.mxu0 }
  0xef   : > { %v4220_v9 = vpop.f32.mrf.mxu2 }
  0xf0   : > { %4979 = vst [vmem:[#allocation12_spill] sm:$0xff] %v4220_v9  ;;  %v703_v55 = vpop.f32.mrf.mxu1 }
  0xf1   : > { %v704_v42 = vadd.f32 %v703_v55, %v4104_v48  ;;  %v1271_v14 = vpop.f32.mrf.mxu3 }
  0xf2   : > { %v1633_v4 = vpop.f32.mrf.mxu0 }
  0xf3   : > { %3292 = vmatmul.msk.bf16.gmra.mxu1 %vm497_vm2, %v3977_v5  ;;  %v1492_v5 = vrot.slane %v1490_v0, 2  ;;  %v1499_v0 = vshll.u32 %v3601_v22, 16 }
  0xf4   : > { %3311 = vmatmul.msk.bf16.gmra.mxu2 %vm497_vm2, %v818_v34 }
  0xf5   : > { %3417 = vmatmul.msk.bf16.gmra.mxu0 %vm497_vm2, %v1485_v51  ;;  %v819_v51 = vrot.slane %v3904_v10, 1  ;;  %v1493_v35 = vor.u32 %v1492_v5, %v1489_v61 }
  0xf6   : > { %3400 = vmatmul.msk.bf16.gmra.mxu3 %vm497_vm2, %v1183_v26 }
  0xf7   : > { %v903_v49 = vpop.f32.mrf.mxu2  ;;  %v820_v56 = vsel %vm799_vm3, %v817_v37, %v819_v51  ;;  %v1494_v8 = vsel %vm1396_vm4, %v1484_v21, %v1493_v35 }
  0xf8   : > { %v993_v41 = vadd.f32 %v903_v49, %v704_v42  ;;  %v705_v27 = vpop.f32.mrf.mxu1 }
  0xf9   : > { %v706_v48 = vadd.f32 %v705_v27, %v4116_v29  ;;  %v1274_v9 = vpop.f32.mrf.mxu3  ;;  %v1184_v29 = vrot.slane %v3602_v24, 1 }
  0xfa   : > { %v1354_v23 = vadd.f32 %v1264_v30, %v993_v41  ;;  %v1635_v18 = vpop.f32.mrf.mxu0 }
  0xfb   : > { %v1185_v21 = vsel %vm799_vm3, %v1182_v58, %v1184_v29  ;;  %v3603_v58 = vld [vmem:[%s3895_s11 + $0x70] sm:$0xff] }
  0xfc   : > { %v4232_v34 = vadd.f32 %v1633_v4, %v1354_v23  ;;  %v1496_v4 = vshrl.u32 %v3601_v22, 16 }
  0xff   : > { %v905_v55 = vpop.f32.mrf.mxu2 }
 0x100   : > { %v994_v42 = vadd.f32 %v905_v55, %v706_v48  ;;  %v708_v49 = vpop.f32.mrf.mxu1  ;;  %v1498_v48 = vrot.slane %v1496_v4, 1  ;;  %v821_v55 = vrot.slane %v3907_v11, 1 }
 0x101   : > { %v709_v61 = vadd.f32 %v708_v49, %v4128_v2  ;;  %v1276_v27 = vpop.f32.mrf.mxu3 }
 0x102   : > { %v1355_v41 = vadd.f32 %v1266_v17, %v994_v42  ;;  %v1638_v30 = vpop.f32.mrf.mxu0 }
 0x103   : > { %3293 = vmatmul.msk.bf16.gmra.mxu1 %vm497_vm2, %v3968_v60 }
 0x104   : > { %3312 = vmatmul.msk.bf16.gmra.mxu2 %vm497_vm2, %v820_v56  ;;  %v4242_v26 = vadd.f32 %v1635_v18, %v1355_v41  ;;  %v1501_v56 = vrot.slane %v1499_v0, 2 }
 0x105   : > { %3418 = vmatmul.msk.bf16.gmra.mxu0 %vm497_vm2, %v1494_v8 }
 0x106   : > { %3401 = vmatmul.msk.bf16.gmra.mxu3 %vm497_vm2, %v1185_v21  ;;  %v1502_v22 = vor.u32 %v1501_v56, %v1498_v48 }
 0x107   : > { %v908_v37 = vpop.f32.mrf.mxu2 }
 0x108   : > { %v995_v17 = vadd.f32 %v908_v37, %v709_v61  ;;  %v710_v23 = vpop.f32.mrf.mxu1  ;;  %v822_v61 = vsel %vm799_vm3, %v819_v51, %v821_v55  ;;  %v1503_v4 = vsel %vm1396_vm4, %v1493_v35, %v1502_v22 }
 0x109   : > { %v711_v2 = vadd.f32 %v710_v23, %v4142_v20  ;;  %v1279_v49 = vpop.f32.mrf.mxu3  ;;  %v1186_v20 = vrot.slane %v3603_v58, 1  ;;  %v1508_v23 = vshll.u32 %v3602_v24, 16 }
 0x10a   : > { %v1356_v5 = vadd.f32 %v1269_v13, %v995_v17  ;;  %v1640_v60 = vpop.f32.mrf.mxu0  ;;  %v1505_v17 = vshrl.u32 %v3602_v24, 16 }
 0x10b   : > { %v1187_v35 = vsel %vm799_vm3, %v1184_v29, %v1186_v20  ;;  %v3604_v29 = vld [vmem:[%s3895_s11 + $0x78] sm:$0xff] }
 0x10c   : > { %v4248_v18 = vadd.f32 %v1638_v30, %v1356_v5  ;;  %v1507_v56 = vrot.slane %v1505_v17, 1 }
 0x10f   : > { %v910_v42 = vpop.f32.mrf.mxu2 }
 0x110   : > { %v996_v41 = vadd.f32 %v910_v42, %v711_v2  ;;  %v713_v8 = vpop.f32.mrf.mxu1  ;;  %v1510_v2 = vrot.slane %v1508_v23, 2  ;;  %v823_v42 = vrot.slane %v3944_v38, 1 }
 0x111   : > { %v714_v0 = vadd.f32 %v713_v8, %v4154_v33  ;;  %v1281_v21 = vpop.f32.mrf.mxu3 }
 0x112   : > { %v1357_v13 = vadd.f32 %v1271_v14, %v996_v41  ;;  %v1643_v37 = vpop.f32.mrf.mxu0  ;;  %v1511_v24 = vor.u32 %v1510_v2, %v1507_v56 }
 0x113   : > { %3294 = vmatmul.msk.bf16.gmra.mxu1 %vm497_vm2, %v3904_v10 }
 0x114   : > { %3313 = vmatmul.msk.bf16.gmra.mxu2 %vm497_vm2, %v822_v61  ;;  %v4258_v30 = vadd.f32 %v1640_v60, %v1357_v13  ;;  %v1512_v17 = vsel %vm1396_vm4, %v1502_v22, %v1511_v24 }
 0x115   : > { %3419 = vmatmul.msk.bf16.gmra.mxu0 %vm497_vm2, %v1503_v4  ;;  %v824_v4 = vsel %vm799_vm3, %v821_v55, %v823_v42 }
 0x116   : > { %3402 = vmatmul.msk.bf16.gmra.mxu3 %vm497_vm2, %v1187_v35 }
 0x117   : > { %v913_v51 = vpop.f32.mrf.mxu2 }
 0x118   : > { %v997_v14 = vadd.f32 %v913_v51, %v714_v0  ;;  %v715_v5 = vpop.f32.mrf.mxu1  ;;  %v1514_v51 = vshrl.u32 %v3603_v58, 16 }
 0x119   : > { %v716_v33 = vadd.f32 %v715_v5, %v4168_v45  ;;  %v1284_v8 = vpop.f32.mrf.mxu3  ;;  %v1188_v45 = vrot.slane %v3604_v29, 1 }
 0x11a   : > { %v1358_v48 = vadd.f32 %v1274_v9, %v997_v14  ;;  %v1645_v10 = vpop.f32.mrf.mxu0  ;;  %v1517_v14 = vshll.u32 %v3603_v58, 16  ;;  %v1516_v56 = vrot.slane %v1514_v51, 1 }
 0x11b   : > { %v1189_v22 = vsel %vm799_vm3, %v1186_v20, %v1188_v45  ;;  %v3605_v20 = vld [vmem:[%s3895_s11 + $0x80] sm:$0xff] }
 0x11c   : > { %v4264_v60 = vadd.f32 %v1643_v37, %v1358_v48  ;;  %v1519_v2 = vrot.slane %v1517_v14, 2  ;;  %v1523_v14 = vshrl.u32 %v3604_v29, 16 }
 0x11e   : > { %v1520_v58 = vor.u32 %v1519_v2, %v1516_v56  ;;  %v827_v2 = vrot.slane %v4015_v52, 1 }
 0x11f   : > { %v915_v41 = vpop.f32.mrf.mxu2 }
 0x120   : > { %v998_v61 = vadd.f32 %v915_v41, %v716_v33  ;;  %v718_v13 = vpop.f32.mrf.mxu1  ;;  %v825_v33 = vrot.slane %v3980_v6, 1 }
 0x121   : > { %v719_v23 = vadd.f32 %v718_v13, %v4180_v57  ;;  %v1286_v5 = vpop.f32.mrf.mxu3 }
 0x122   : > { %v1359_v9 = vadd.f32 %v1276_v27, %v998_v61  ;;  %v1648_v0 = vpop.f32.mrf.mxu0 }
 0x123   : > { %3295 = vmatmul.msk.bf16.gmra.mxu1 %vm497_vm2, %v3907_v11 }
 0x124   : > { %3314 = vmatmul.msk.bf16.gmra.mxu2 %vm497_vm2, %v824_v4  ;;  %v4274_v37 = vadd.f32 %v1645_v10, %v1359_v9  ;;  %v826_v9 = vsel %vm799_vm3, %v823_v42, %v825_v33 }
 0x125   : > { %3420 = vmatmul.msk.bf16.gmra.mxu0 %vm497_vm2, %v1512_v17 }
 0x126   : > { %3403 = vmatmul.msk.bf16.gmra.mxu3 %vm497_vm2, %v1189_v22 }
 0x127   : > { %v918_v55 = vpop.f32.mrf.mxu2 }
 0x128   : > { %v999_v27 = vadd.f32 %v918_v55, %v719_v23  ;;  %v720_v35 = vpop.f32.mrf.mxu1  ;;  %v1521_v23 = vsel %vm1396_vm4, %v1511_v24, %v1520_v58  ;;  %v1526_v55 = vshll.u32 %v3604_v29, 16 }
 0x129   : > { %v721_v57 = vadd.f32 %v720_v35, %v4194_v19  ;;  %v1289_v61 = vpop.f32.mrf.mxu3  ;;  %v1190_v19 = vrot.slane %v3605_v20, 1 }
 0x12a   : > { %v1360_v48 = vadd.f32 %v1279_v49, %v999_v27  ;;  %v1650_v11 = vpop.f32.mrf.mxu0  ;;  %v1528_v56 = vrot.slane %v1526_v55, 2  ;;  %v1535_v55 = vshll.u32 %v3605_v20, 16 }
 0x12b   : > { %v1191_v24 = vsel %vm799_vm3, %v1188_v45, %v1190_v19  ;;  %v3606_v45 = vld [vmem:[%s3895_s11 + $0x88] sm:$0xff] }
 0x12c   : > { %v4280_v10 = vadd.f32 %v1648_v0, %v1360_v48  ;;  %v1525_v48 = vrot.slane %v1523_v14, 1  ;;  %v1532_v14 = vshrl.u32 %v3605_v20, 16 }
 0x12e   : > { %v1529_v29 = vor.u32 %v1528_v56, %v1525_v48  ;;  %v829_v48 = vrot.slane %v3931_v31, 1 }
 0x12f   : > { %v920_v41 = vpop.f32.mrf.mxu2 }
 0x130   : > { %v1000_v13 = vadd.f32 %v920_v41, %v721_v57  ;;  %v723_v4 = vpop.f32.mrf.mxu1 }
 0x131   : > { %v724_v51 = vadd.f32 %v723_v4, %v4204_v36  ;;  %v1291_v27 = vpop.f32.mrf.mxu3 }
 0x132   : > { %v1361_v49 = vadd.f32 %v1281_v21, %v1000_v13  ;;  %v1653_v17 = vpop.f32.mrf.mxu0 }
 0x133   : > { %3296 = vmatmul.msk.bf16.gmra.mxu1 %vm497_vm2, %v3944_v38 }
 0x134   : > { %3315 = vmatmul.msk.bf16.gmra.mxu2 %vm497_vm2, %v826_v9  ;;  %v4290_v0 = vadd.f32 %v1650_v11, %v1361_v49  ;;  %v828_v9 = vsel %vm799_vm3, %v825_v33, %v827_v2 }
 0x135   : > { %3421 = vmatmul.msk.bf16.gmra.mxu0 %vm497_vm2, %v1521_v23  ;;  %v1530_v23 = vsel %vm1396_vm4, %v1520_v58, %v1529_v29 }
 0x136   : > { %3404 = vmatmul.msk.bf16.gmra.mxu3 %vm497_vm2, %v1191_v24  ;;  %v1534_v24 = vrot.slane %v1532_v14, 1 }
 0x137   : > { %v923_v42 = vpop.f32.mrf.mxu2 }
 0x138   : > { %v1001_v21 = vadd.f32 %v923_v42, %v724_v51  ;;  %v725_v35 = vpop.f32.mrf.mxu1 }
 0x139   : > { %v726_v36 = vadd.f32 %v725_v35, %v4216_v1  ;;  %v1294_v41 = vpop.f32.mrf.mxu3  ;;  %v1192_v1 = vrot.slane %v3606_v45, 1 }
 0x13a   : > { %v1362_v22 = vadd.f32 %v1284_v8, %v1001_v21  ;;  %v1655_v38 = vpop.f32.mrf.mxu0 }
 0x13b   : > { %v1193_v58 = vsel %vm799_vm3, %v1190_v19, %v1192_v1  ;;  %v3607_v19 = vld [vmem:[%s3895_s11 + $0x90] sm:$0xff] }
 0x13c   : > { %v4296_v11 = vadd.f32 %v1653_v17, %v1362_v22  ;;  %v1537_v22 = vrot.slane %v1535_v55, 2 }
 0x13e   : > { %v1538_v20 = vor.u32 %v1537_v22, %v1534_v24 }
 0x13f   : > { %v925_v57 = vpop.f32.mrf.mxu2 }
 0x140   : > { %v1002_v13 = vadd.f32 %v925_v57, %v726_v36  ;;  %v728_v4 = vpop.f32.mrf.mxu1 }
 0x141   : > { %v729_v51 = vadd.f32 %v728_v4, %v4100_v46  ;;  %v1296_v42 = vpop.f32.mrf.mxu3  ;;  %v830_v4 = vsel %vm799_vm3, %v827_v2, %v829_v48  ;;  %v1541_v2 = vshrl.u32 %v3606_v45, 16 }
 0x142   : > { %v1363_v8 = vadd.f32 %v1286_v5, %v1002_v13  ;;  %v1658_v49 = vpop.f32.mrf.mxu0 }
 0x143   : > { %3297 = vmatmul.msk.bf16.gmra.mxu1 %vm497_vm2, %v3980_v6 }
 0x144   : > { %3316 = vmatmul.msk.bf16.gmra.mxu2 %vm497_vm2, %v828_v9  ;;  %v4306_v17 = vadd.f32 %v1655_v38, %v1363_v8  ;;  %v1539_v8 = vsel %vm1396_vm4, %v1529_v29, %v1538_v20 }
 0x145   : > { %3422 = vmatmul.msk.bf16.gmra.mxu0 %vm497_vm2, %v1530_v23  ;;  %v1544_v23 = vshll.u32 %v3606_v45, 16 }
 0x146   : > { %3405 = vmatmul.msk.bf16.gmra.mxu3 %vm497_vm2, %v1193_v58  ;;  %v1065_v58 = vld [vmem:[%s3895_s11 + $0x98] sm:$0x1] }
 0x147   : > { %v928_v33 = vpop.f32.mrf.mxu2 }
 0x148   : > { %v1003_v5 = vadd.f32 %v928_v33, %v729_v51  ;;  %v730_v21 = vpop.f32.mrf.mxu1 }
 0x149   : > { %v731_v46 = vadd.f32 %v730_v21, %v4113_v54  ;;  %v1299_v36 = vpop.f32.mrf.mxu3  ;;  %v1194_v54 = vrot.slane %v3607_v19, 1  ;;  %v1546_v21 = vrot.slane %v1544_v23, 2 }
 0x14a   : > { %v1364_v35 = vadd.f32 %v1289_v61, %v1003_v5  ;;  %v1660_v6 = vpop.f32.mrf.mxu0  ;;  %v1543_v5 = vrot.slane %v1541_v2, 1  ;;  %v3697_v2 = vld [vmem:[%s3895_s11 + $0x78] sm:$0xff] }
 0x14c   : > { %v4312_v38 = vadd.f32 %v1658_v49, %v1364_v35 }
 0x14f   : > { %v930_v56 = vpop.f32.mrf.mxu2 }
 0x150   : > { %v1004_v57 = vadd.f32 %v930_v56, %v731_v46  ;;  %v733_v13 = vpop.f32.mrf.mxu1 }
 0x151   : > { %v734_v49 = vadd.f32 %v733_v13, %v4124_v62  ;;  %v4326_v51 = vpop.f32.mrf.mxu3  ;;  %v4334_v62 = vld [vmem:[%s3895_s11 + $0x80] sm:$0xff] }
 0x152   : > { %v1365_v61 = vadd.f32 %v1291_v27, %v1004_v57  ;;  %v1663_v9 = vpop.f32.mrf.mxu0  ;;  %v831_v45 = vrot.slane %v4334_v62, 1 }
 0x153   : > { %3298 = vmatmul.msk.bf16.gmra.mxu1 %vm497_vm2, %v4015_v52  ;;  %v1195_v52 = vsel %vm799_vm3, %v1192_v1, %v1194_v54  ;;  %v1547_v1 = vor.u32 %v1546_v21, %v1543_v5  ;;  %v4358_v21 = vld [vmem:[%s3895_s11 + $0x18] sm:$0xff] }
 0x154   : > { %3317 = vmatmul.msk.bf16.gmra.mxu2 %vm497_vm2, %v830_v4  ;;  %v4322_v31 = vadd.f32 %v1660_v6, %v1365_v61  ;;  %v1141_v6 = vunpack.c.l.b16 %v1065_v58  ;;  %v832_v57 = vsel %vm799_vm3, %v829_v48, %v831_v45 }
 0x155   : > { %3423 = vmatmul.msk.bf16.gmra.mxu0 %vm497_vm2, %v1539_v8  ;;  %v1995_v8 = vld [vmem:[%s3895_s11 + $0x10] sm:$0xc] }
 0x156   : > { %3406 = vmatmul.msk.bf16.gmra.mxu3 %vm497_vm2, %v1195_v52  ;;  %v1160_v13 = vpack.c.b16 %v1141_v6, %v1141_v6  ;;  %v2071_v48 = vunpack.c.l.b16 %v1995_v8 }
 0x157   : > { %v933_v27 = vpop.f32.mrf.mxu2 }
 0x158   : > { %v1005_v29 = vadd.f32 %v933_v27, %v734_v49  ;;  %v735_v14 = vpop.f32.mrf.mxu1  ;;  %v4344_v49 = vld [vmem:[%s3895_s11 + $0x14] sm:$0xf]  ;;  %v1196_v23 = vrot.slane %v1160_v13, 1  ;;  %v1550_v27 = vshrl.u32 %v3607_v19, 16 }
 0x159   : > { %v736_v24 = vadd.f32 %v735_v14, %v4139_v12  ;;  %v4338_v22 = vpop.f32.mrf.mxu3 }
 0x15a   : > { %v1366_v55 = vadd.f32 %v1294_v41, %v1005_v29  ;;  %v1665_v33 = vpop.f32.mrf.mxu0  ;;  %v1553_v29 = vshll.u32 %v3607_v19, 16 }
 0x15c   : > { %v4331_v35 = vadd.f32 %v1663_v9, %v1366_v55  ;;  %v1548_v9 = vsel %vm1396_vm4, %v1538_v20, %v1547_v1 }
 0x15f   : > { %v935_v41 = vpop.f32.mrf.mxu2 }
 0x160   : > { %v1006_v46 = vadd.f32 %v935_v41, %v736_v24  ;;  %v738_v56 = vpop.f32.mrf.mxu1  ;;  %v1552_v41 = vrot.slane %v1550_v27, 1 }
 0x161   : > { %v739_v20 = vadd.f32 %v738_v56, %v4150_v28  ;;  %v4354_v52 = vpop.f32.mrf.mxu3  ;;  %v1390_v28 = vld [vmem:[%s3895_s11 + $0x98] sm:$0x3]  ;;  %v4366_v56 = vld [vmem:[%s3895_s11 + $0x88] sm:$0xff] }
 0x162   : > { %v1367_v4 = vadd.f32 %v1296_v42, %v1006_v46  ;;  %v1668_v61 = vpop.f32.mrf.mxu0  ;;  %v4969_v42 = vunpack.c.l.b16 %v4344_v49  ;;  %v1555_v46 = vrot.slane %v1553_v29, 2  ;;  %v833_v19 = vrot.slane %v4366_v56, 1 }
 0x163   : > { %3299 = vmatmul.msk.bf16.gmra.mxu1 %vm497_vm2, %v3697_v2  ;;  %v1394_v2 = vunpack.c.l.b16 %v1390_v28 }
 0x164   : > { %3318 = vmatmul.msk.bf16.gmra.mxu2 %vm497_vm2, %v832_v57  ;;  %v4349_v12 = vadd.f32 %v1665_v33, %v1367_v4  ;;  %v1197_v33 = vsel %vm799_vm3, %v1194_v54, %v1196_v23  ;;  %v4362_v58 = vpack.c.b16 %v4969_v42, %v2071_v48  ;;  %v2372_v4 = vshrl.u32 %v4358_v21, 16 }
 0x165   : > { %3424 = vmatmul.msk.bf16.gmra.mxu0 %vm497_vm2, %v1548_v9  ;;  %v1556_v8 = vor.u32 %v1555_v46, %v1552_v41  ;;  %v834_v27 = vsel %vm799_vm3, %v831_v45, %v833_v19 }
 0x166   : > { %4980 = vst [vmem:[#allocation13_spill] sm:$0xff] %v4349_v12  ;;  %3407 = vmatmul.msk.bf16.gmra.mxu3 %vm497_vm2, %v1197_v33  ;;  %v2364_v54 = vshrl.u32 %v4362_v58, 16  ;;  %v2367_v13 = vshll.u32 %v4362_v58, 16  ;;  %v4382_v12 = vpack.c.b16 %v1394_v2, %v1394_v2  ;;  %v835_v2 = vrot.slane %v4004_v40, 1 }
 0x167   : > { %v938_v14 = vpop.f32.mrf.mxu2 }
 0x168   : > { %v1007_v55 = vadd.f32 %v938_v14, %v739_v20  ;;  %v740_v5 = vpop.f32.mrf.mxu1  ;;  %v2366_v29 = vrot.slane %v2364_v54, 2  ;;  %v2369_v14 = vrot.slane %v2367_v13, 3 }
 0x169   : > { %v741_v9 = vadd.f32 %v740_v5, %v4165_v44  ;;  %v4377_v48 = vpop.f32.mrf.mxu3 }
 0x16a   : > { %v1368_v6 = vadd.f32 %v1299_v36, %v1007_v55  ;;  %v1670_v24 = vpop.f32.mrf.mxu0  ;;  %v2375_v36 = vshll.u32 %v4358_v21, 16  ;;  %v2374_v55 = vrot.slane %v2372_v4, 2  ;;  %v2370_v45 = vor.u32 %v2369_v14, %v2366_v29 }
 0x16c   : > { %v4370_v57 = vadd.f32 %v1668_v61, %v1368_v6  ;;  %v2377_v33 = vrot.slane %v2375_v36, 3 }
 0x16e   : > { %4981 = vst [vmem:[#allocation14_spill] sm:$0xff] %v4370_v57  ;;  %v1557_v57 = vsel %vm1396_vm4, %v1547_v1, %v1556_v8  ;;  %v2378_v5 = vor.u32 %v2377_v33, %v2374_v55  ;;  %v1562_v1 = vshll.u32 %v4382_v12, 16  ;;  %v836_v33 = vsel %vm799_vm3, %v833_v19, %v835_v2  ;;  %v4427_v2 = vld [vmem:[%s3895_s11 + $0x28] sm:$0xff] }
 0x16f   : > { %v940_v23 = vpop.f32.mrf.mxu2 }
 0x170   : > { %v1008_v20 = vadd.f32 %v940_v23, %v741_v9  ;;  %v743_v61 = vpop.f32.mrf.mxu1  ;;  %v2379_v13 = vsel %vm2362_vm5, %v2370_v45, %v2378_v5 }
 0x171   : > { %v744_v41 = vadd.f32 %v743_v61, %v4176_v43  ;;  %v4393_v28 = vpop.f32.mrf.mxu3  ;;  %v1564_v43 = vrot.slane %v1562_v1, 2  ;;  %v2725_v1 = vld [vmem:[%s3895_s11 + $0x10] sm:$0x8] }
 0x172   : > { %v1369_v6 = vadd.f32 %v4326_v51, %v1008_v20  ;;  %v1673_v42 = vpop.f32.mrf.mxu0  ;;  %v1559_v51 = vshrl.u32 %v4382_v12, 16 }
 0x173   : > { %3300 = vmatmul.msk.bf16.gmra.mxu1 %vm497_vm2, %v4334_v62 }
 0x174   : > { %3319 = vmatmul.msk.bf16.gmra.mxu2 %vm497_vm2, %v834_v27  ;;  %v4387_v44 = vadd.f32 %v1670_v24, %v1369_v6  ;;  %v4397_v24 = vld [vmem:[%s3895_s11 + $0x20] sm:$0xff]  ;;  %v1561_v36 = vrot.slane %v1559_v51, 1  ;;  %v1759_v6 = vld [vmem:[%s3895_s11 + $0x8] sm:$0xc] }
 0x175   : > { %3425 = vmatmul.msk.bf16.gmra.mxu0 %vm497_vm2, %v1557_v57  ;;  %v2381_v23 = vshrl.u32 %v4397_v24, 16  ;;  %v2384_v20 = vshll.u32 %v4397_v24, 16 }
 0x176   : > { %3534 = vmatmul.msk.bf16.vlgmr.msra.gmra.mxu3 %vm497_vm2, %v2379_v13  ;;  %v1565_v61 = vor.u32 %v1564_v43, %v1561_v36 }
 0x177   : > { %v943_v46 = vpop.f32.mrf.mxu2  ;;  %v2386_v45 = vrot.slane %v2384_v20, 3  ;;  %v4983_v20 = vunpack.c.l.b16 %v4344_v49 }
 0x178   : > { %v1009_v54 = vadd.f32 %v943_v46, %v744_v41  ;;  %v745_v62 = vpop.f32.mrf.mxu1  ;;  %v1566_v51 = vsel %vm1396_vm4, %v1556_v8, %v1565_v61  ;;  %v3699_v61 = vld [vmem:[%s3895_s11 + $0x10] sm:$0xff] }
 0x179   : > { %v746_v27 = vadd.f32 %v745_v62, %v4191_v7  ;;  %v1763_v7 = vunpack.c.l.b16 %v1759_v6  ;;  %v2733_v6 = vrot.slane %v4358_v21, 3 }
 0x17a   : > { %v1370_v57 = vadd.f32 %v4338_v22, %v1009_v54  ;;  %v1675_v4 = vpop.f32.mrf.mxu0  ;;  %v4407_v22 = vpop.f32.mrf.mxu3 }
 0x17c   : > { %v4401_v9 = vadd.f32 %v1673_v42, %v1370_v57  ;;  %v2383_v42 = vrot.slane %v2381_v23, 2  ;;  %v4982_v57 = vunpack.c.l.b16 %v4026_v63  ;;  %v2127_v63 = vrot.slane %v4362_v58, 2 }
 0x17e   : > { %v2387_v19 = vor.u32 %v2386_v45, %v2383_v42  ;;  %v1764_v36 = vpack.c.b16 %v4982_v57, %v1763_v7 }
 0x17f   : > { %v945_v29 = vpop.f32.mrf.mxu2 }
 0x180   : > { %v1010_v14 = vadd.f32 %v945_v29, %v746_v27  ;;  %v748_v55 = vpop.f32.mrf.mxu1  ;;  %v2388_v43 = vsel %vm2362_vm5, %v2378_v5, %v2387_v19  ;;  %v1767_v29 = vrot.slane %v3699_v61, 2  ;;  %v2390_v5 = vshrl.u32 %v4427_v2, 16 }
 0x181   : > { %v749_v54 = vadd.f32 %v748_v55, %v4200_v32  ;;  %v1766_v32 = vrot.slane %v1764_v36, 2  ;;  %v2128_v55 = vrot.slane %v4358_v21, 2 }
 0x182   : > { %v1371_v40 = vadd.f32 %v4354_v52, %v1010_v14  ;;  %v1678_v41 = vpop.f32.mrf.mxu0  ;;  %v2729_v52 = vunpack.c.l.b16 %v2725_v1  ;;  %v4421_v13 = vpop.f32.mrf.mxu3  ;;  %v2392_v1 = vrot.slane %v2390_v5, 2 }
 0x183   : > { %3301 = vmatmul.msk.bf16.gmra.mxu1 %vm497_vm2, %v4366_v56  ;;  %v2129_v58 = vsel %vm1765_vm6, %v2127_v63, %v2128_v55  ;;  %v2130_v63 = vrot.slane %v4397_v24, 2 }
 0x184   : > { %3320 = vmatmul.msk.bf16.gmra.mxu2 %vm497_vm2, %v836_v33  ;;  %v4417_v46 = vadd.f32 %v1675_v4, %v1371_v40  ;;  %v2730_v27 = vpack.c.b16 %v4983_v20, %v2729_v52  ;;  %v2393_v33 = vshll.u32 %v4427_v2, 16 }
 0x185   : > { %3426 = vmatmul.msk.bf16.gmra.mxu0 %vm497_vm2, %v1566_v51  ;;  %v1768_v51 = vsel %vm1765_vm6, %v1766_v32, %v1767_v29  ;;  %v3700_v32 = vld [vmem:[%s3895_s11 + $0x18] sm:$0xff] }
 0x186   : > { %3535 = vmatmul.msk.bf16.gmra.mxu3 %vm497_vm2, %v2388_v43  ;;  %v2732_v49 = vrot.slane %v2730_v27, 3  ;;  %v2395_v7 = vrot.slane %v2393_v33, 3  ;;  %v1769_v61 = vrot.slane %v3700_v32, 2 }
 0x187   : > { %v948_v62 = vpop.f32.mrf.mxu2 }
 0x188   : > { %v1011_v8 = vadd.f32 %v948_v62, %v749_v54  ;;  %v750_v56 = vpop.f32.mrf.mxu1  ;;  %v2396_v62 = vor.u32 %v2395_v7, %v2392_v1 }
 0x18a   : > { %v1372_v4 = vadd.f32 %v4377_v48, %v1011_v8  ;;  %v1680_v23 = vpop.f32.mrf.mxu0  ;;  %v751_v48 = vadd.f32 %v750_v56, %v4213_v47  ;;  %v1319_v45 = vpop.f32.mrf.mxu3  ;;  %v2734_v47 = vsel %vm2731_vm7, %v2732_v49, %v2733_v6 }
 0x18c   : > { %v4434_v14 = vadd.f32 %v1678_v41, %v1372_v4  ;;  %v4454_v4 = vld [vmem:[%s3895_s11 + $0x30] sm:$0xff] }
 0x18d   : > { %v2402_v5 = vshll.u32 %v4454_v4, 16 }
 0x18f   : > { %v950_v42 = vpop.f32.mrf.mxu2 }
 0x190   : > { %v1012_v40 = vadd.f32 %v950_v42, %v751_v48  ;;  %v753_v41 = vpop.f32.mrf.mxu1 }
 0x191   : > { %v754_v8 = vadd.f32 %v753_v41, %v4111_v53  ;;  %v2399_v53 = vshrl.u32 %v4454_v4, 16  ;;  %v2131_v41 = vsel %vm1765_vm6, %v2128_v55, %v2130_v63 }
 0x192   : > { %v1373_v54 = vadd.f32 %v4393_v28, %v1012_v40  ;;  %v1683_v52 = vpop.f32.mrf.mxu0  ;;  %v1321_v36 = vpop.f32.mrf.mxu3  ;;  %v2397_v28 = vsel %vm2362_vm5, %v2387_v19, %v2396_v62  ;;  %v2735_v19 = vrot.slane %v4397_v24, 3  ;;  %v1770_v40 = vsel %vm1765_vm6, %v1767_v29, %v1769_v61 }
 0x193   : > { %3428 = vmatmul.msk.bf16.vlgmr.msra.gmra.mxu1 %vm497_vm2, %v1768_v51  ;;  %v2401_v51 = vrot.slane %v2399_v53, 2 }
 0x194   : > { %3515 = vmatmul.msk.bf16.vlgmr.msra.gmra.mxu2 %vm497_vm2, %v2129_v58  ;;  %v4448_v21 = vadd.f32 %v1680_v23, %v1373_v54  ;;  %v2404_v58 = vrot.slane %v2402_v5, 3  ;;  %v2736_v54 = vsel %vm2731_vm7, %v2733_v6, %v2735_v19 }
 0x195   : > { %3553 = vmatmul.msk.bf16.vlgmr.msra.gmra.mxu0 %vm497_vm2, %v2734_v47 }
 0x196   : > { %3536 = vmatmul.msk.bf16.gmra.mxu3 %vm497_vm2, %v2397_v28  ;;  %v2405_v24 = vor.u32 %v2404_v58, %v2401_v51  ;;  %v3701_v28 = vld [vmem:[%s3895_s11 + $0x20] sm:$0xff] }
 0x197   : > { %v953_v57 = vpop.f32.mrf.mxu2 }
 0x198   : > { %v1013_v56 = vadd.f32 %v953_v57, %v754_v8  ;;  %v755_v43 = vpop.f32.mrf.mxu1  ;;  %v4478_v57 = vld [vmem:[%s3895_s11 + $0x38] sm:$0xff] }
 0x199   : > { %v756_v33 = vadd.f32 %v755_v43, %v4120_v59  ;;  %v2411_v32 = vshll.u32 %v4478_v57, 16 }
 0x19a   : > { %v1374_v20 = vadd.f32 %v4407_v22, %v1013_v56  ;;  %v1685_v27 = vpop.f32.mrf.mxu0  ;;  %v1324_v49 = vpop.f32.mrf.mxu3 }
 0x19c   : > { %v4458_v23 = vadd.f32 %v1683_v52, %v1374_v20  ;;  %v1771_v20 = vrot.slane %v3701_v28, 2 }
 0x19f   : > { %v955_v48 = vpop.f32.mrf.mxu2 }
 0x1a0   : > { %v1014_v22 = vadd.f32 %v955_v48, %v756_v33  ;;  %v758_v42 = vpop.f32.mrf.mxu1 }
 0x1a1   : > { %v759_v29 = vadd.f32 %v758_v42, %v4135_v16  ;;  %v2408_v16 = vshrl.u32 %v4478_v57, 16 }
 0x1a2   : > { %v1375_v1 = vadd.f32 %v4421_v13, %v1014_v22  ;;  %v1688_v7 = vpop.f32.mrf.mxu0  ;;  %v1326_v52 = vpop.f32.mrf.mxu3  ;;  %v2406_v13 = vsel %vm2362_vm5, %v2396_v62, %v2405_v24  ;;  %v2737_v62 = vrot.slane %v4427_v2, 3  ;;  %v1772_v22 = vsel %vm1765_vm6, %v1769_v61, %v1771_v20 }
 0x1a3   : > { %3429 = vmatmul.msk.bf16.gmra.mxu1 %vm497_vm2, %v1770_v40  ;;  %v2410_v40 = vrot.slane %v2408_v16, 2 }
 0x1a4   : > { %3516 = vmatmul.msk.bf16.gmra.mxu2 %vm497_vm2, %v2131_v41  ;;  %v4472_v59 = vadd.f32 %v1685_v27, %v1375_v1  ;;  %v2132_v27 = vrot.slane %v4427_v2, 2  ;;  %v2413_v41 = vrot.slane %v2411_v32, 3  ;;  %v2738_v1 = vsel %vm2731_vm7, %v2735_v19, %v2737_v62 }
 0x1a5   : > { %3554 = vmatmul.msk.bf16.gmra.mxu0 %vm497_vm2, %v2736_v54 }
 0x1a6   : > { %3537 = vmatmul.msk.bf16.gmra.mxu3 %vm497_vm2, %v2406_v13  ;;  %v2133_v42 = vsel %vm1765_vm6, %v2130_v63, %v2132_v27  ;;  %v2414_v2 = vor.u32 %v2413_v41, %v2410_v40  ;;  %v3702_v13 = vld [vmem:[%s3895_s11 + $0x28] sm:$0xff] }
 0x1a7   : > { %v958_v55 = vpop.f32.mrf.mxu2 }
 0x1a8   : > { %v1015_v47 = vadd.f32 %v958_v55, %v759_v29  ;;  %v760_v8 = vpop.f32.mrf.mxu1  ;;  %v4500_v55 = vld [vmem:[%s3895_s11 + $0x40] sm:$0xff] }
 0x1a9   : > { %v761_v53 = vadd.f32 %v760_v8, %v4146_v25  ;;  %v2420_v28 = vshll.u32 %v4500_v55, 16 }
 0x1aa   : > { %v1376_v6 = vadd.f32 %v1319_v45, %v1015_v47  ;;  %v1690_v56 = vpop.f32.mrf.mxu0  ;;  %v1329_v33 = vpop.f32.mrf.mxu3 }
 0x1ac   : > { %v4481_v43 = vadd.f32 %v1688_v7, %v1376_v6  ;;  %v1773_v6 = vrot.slane %v3702_v13, 2 }
 0x1af   : > { %v960_v5 = vpop.f32.mrf.mxu2 }
 0x1b0   : > { %v1016_v45 = vadd.f32 %v960_v5, %v761_v53  ;;  %v763_v48 = vpop.f32.mrf.mxu1 }
 0x1b1   : > { %v764_v61 = vadd.f32 %v763_v48, %v4161_v39  ;;  %v2417_v39 = vshrl.u32 %v4500_v55, 16 }
 0x1b2   : > { %v1377_v51 = vadd.f32 %v1321_v36, %v1016_v45  ;;  %v1693_v58 = vpop.f32.mrf.mxu0  ;;  %v1331_v7 = vpop.f32.mrf.mxu3  ;;  %v2415_v36 = vsel %vm2362_vm5, %v2405_v24, %v2414_v2  ;;  %v2739_v24 = vrot.slane %v4454_v4, 3  ;;  %v1774_v45 = vsel %vm1765_vm6, %v1771_v20, %v1773_v6 }
 0x1b3   : > { %3430 = vmatmul.msk.bf16.gmra.mxu1 %vm497_vm2, %v1772_v22  ;;  %v2419_v22 = vrot.slane %v2417_v39, 2 }
 0x1b4   : > { %3517 = vmatmul.msk.bf16.gmra.mxu2 %vm497_vm2, %v2133_v42  ;;  %v4494_v25 = vadd.f32 %v1690_v56, %v1377_v51  ;;  %v2134_v56 = vrot.slane %v4454_v4, 2  ;;  %v2422_v42 = vrot.slane %v2420_v28, 3  ;;  %v2740_v51 = vsel %vm2731_vm7, %v2737_v62, %v2739_v24 }
 0x1b5   : > { %3555 = vmatmul.msk.bf16.gmra.mxu0 %vm497_vm2, %v2738_v1 }
 0x1b6   : > { %3538 = vmatmul.msk.bf16.gmra.mxu3 %vm497_vm2, %v2415_v36  ;;  %v2135_v48 = vsel %vm1765_vm6, %v2132_v27, %v2134_v56  ;;  %v2423_v4 = vor.u32 %v2422_v42, %v2419_v22  ;;  %v3703_v36 = vld [vmem:[%s3895_s11 + $0x30] sm:$0xff] }
 0x1b7   : > { %v963_v63 = vpop.f32.mrf.mxu2 }
 0x1b8   : > { %v1017_v54 = vadd.f32 %v963_v63, %v764_v61  ;;  %v765_v29 = vpop.f32.mrf.mxu1  ;;  %v4522_v63 = vld [vmem:[%s3895_s11 + $0x48] sm:$0xff] }
 0x1b9   : > { %v766_v16 = vadd.f32 %v765_v29, %v4172_v50  ;;  %v2429_v13 = vshll.u32 %v4522_v63, 16 }
 0x1ba   : > { %v1378_v19 = vadd.f32 %v1324_v49, %v1017_v54  ;;  %v1695_v47 = vpop.f32.mrf.mxu0  ;;  %v1334_v53 = vpop.f32.mrf.mxu3 }
 0x1bc   : > { %v4503_v8 = vadd.f32 %v1693_v58, %v1378_v19  ;;  %v1775_v19 = vrot.slane %v3703_v36, 2  ;;  %v2138_v36 = vrot.slane %v4500_v55, 2 }
 0x1bf   : > { %v965_v32 = vpop.f32.mrf.mxu2 }
 0x1c0   : > { %v1018_v49 = vadd.f32 %v965_v32, %v766_v16  ;;  %v768_v5 = vpop.f32.mrf.mxu1 }
 0x1c1   : > { %v769_v20 = vadd.f32 %v768_v5, %v4187_v3  ;;  %v2426_v3 = vshrl.u32 %v4522_v63, 16 }
 0x1c2   : > { %v1379_v40 = vadd.f32 %v1326_v52, %v1018_v49  ;;  %v1698_v41 = vpop.f32.mrf.mxu0  ;;  %v1336_v58 = vpop.f32.mrf.mxu3  ;;  %v2424_v52 = vsel %vm2362_vm5, %v2414_v2, %v2423_v4  ;;  %v2741_v2 = vrot.slane %v4478_v57, 3  ;;  %v1776_v49 = vsel %vm1765_vm6, %v1773_v6, %v1775_v19  ;;  %v4984_v6 = vld [vmem:[#allocation11_spill] sm:$0xff] }
 0x1c3   : > { %3431 = vmatmul.msk.bf16.gmra.mxu1 %vm497_vm2, %v1774_v45  ;;  %v2428_v45 = vrot.slane %v2426_v3, 2 }
 0x1c4   : > { %3518 = vmatmul.msk.bf16.gmra.mxu2 %vm497_vm2, %v2135_v48  ;;  %v4516_v50 = vadd.f32 %v1695_v47, %v1379_v40  ;;  %v2136_v47 = vrot.slane %v4478_v57, 2  ;;  %v2431_v48 = vrot.slane %v2429_v13, 3  ;;  %v2742_v40 = vsel %vm2731_vm7, %v2739_v24, %v2741_v2 }
 0x1c5   : > { %3556 = vmatmul.msk.bf16.gmra.mxu0 %vm497_vm2, %v2740_v51 }
 0x1c6   : > { %3539 = vmatmul.msk.bf16.gmra.mxu3 %vm497_vm2, %v2424_v52  ;;  %v2137_v5 = vsel %vm1765_vm6, %v2134_v56, %v2136_v47  ;;  %v2432_v57 = vor.u32 %v2431_v48, %v2428_v45  ;;  %v2139_v45 = vsel %vm1765_vm6, %v2136_v47, %v2138_v36 }
 0x1c7   : > { %v968_v27 = vpop.f32.mrf.mxu2 }
 0x1c8   : > { %v1019_v1 = vadd.f32 %v968_v27, %v769_v20  ;;  %v770_v61 = vpop.f32.mrf.mxu1 }
 0x1c9   : > { %v771_v39 = vadd.f32 %v770_v61, %v4198_v15 }
 0x1ca   : > { %v1380_v62 = vadd.f32 %v1329_v33, %v1019_v1  ;;  %v1700_v54 = vpop.f32.mrf.mxu0  ;;  %v1339_v16 = vpop.f32.mrf.mxu3  ;;  %v4544_v1 = vld [vmem:[%s3895_s11 + $0x50] sm:$0xff] }
 0x1cb   : > { %v2435_v3 = vshrl.u32 %v4544_v1, 16  ;;  %v2438_v13 = vshll.u32 %v4544_v1, 16 }
 0x1cc   : > { %v4525_v29 = vadd.f32 %v1698_v41, %v1380_v62  ;;  %v3704_v62 = vld [vmem:[%s3895_s11 + $0x38] sm:$0xff] }
 0x1cd   : > { %v2437_v48 = vrot.slane %v2435_v3, 2 }
 0x1cf   : > { %v970_v28 = vpop.f32.mrf.mxu2 }
 0x1d0   : > { %v1020_v33 = vadd.f32 %v970_v28, %v771_v39  ;;  %v773_v32 = vpop.f32.mrf.mxu1  ;;  %v4985_v39 = vld [vmem:[#allocation12_spill] sm:$0xff] }
 0x1d1   : > { %v774_v41 = vadd.f32 %v773_v32, %v4984_v6 }
 0x1d2   : > { %v1381_v22 = vadd.f32 %v1331_v7, %v1020_v33  ;;  %v1703_v42 = vpop.f32.mrf.mxu0  ;;  %v1341_v51 = vpop.f32.mrf.mxu3  ;;  %v2433_v7 = vsel %vm2362_vm5, %v2423_v4, %v2432_v57  ;;  %v2743_v4 = vrot.slane %v4500_v55, 3 }
 0x1d3   : > { %3432 = vmatmul.msk.bf16.gmra.mxu1 %vm497_vm2, %v1776_v49 }
 0x1d4   : > { %3519 = vmatmul.msk.bf16.gmra.mxu2 %vm497_vm2, %v2137_v5  ;;  %v4538_v15 = vadd.f32 %v1700_v54, %v1381_v22  ;;  %v1777_v54 = vrot.slane %v3704_v62, 2  ;;  %v2440_v22 = vrot.slane %v2438_v13, 3  ;;  %v2744_v6 = vsel %vm2731_vm7, %v2741_v2, %v2743_v4 }
 0x1d5   : > { %3557 = vmatmul.msk.bf16.gmra.mxu0 %vm497_vm2, %v2742_v40 }
 0x1d6   : > { %3540 = vmatmul.msk.bf16.gmra.mxu3 %vm497_vm2, %v2433_v7  ;;  %v1778_v5 = vsel %vm1765_vm6, %v1775_v19, %v1777_v54  ;;  %v4986_v19 = vld [vmem:[#allocation5_spill] sm:$0xff] }
 0x1d7   : > { %v973_v56 = vpop.f32.mrf.mxu2 }
 0x1d8   : > { %v1021_v20 = vadd.f32 %v973_v56, %v774_v41  ;;  %v775_v27 = vpop.f32.mrf.mxu1  ;;  %v2441_v41 = vor.u32 %v2440_v22, %v2437_v48 }
 0x1d9   : > { %v776_v28 = vadd.f32 %v775_v27, %v4985_v39  ;;  %v2140_v39 = vrot.slane %v4522_v63, 2 }
 0x1da   : > { %v1382_v24 = vadd.f32 %v1334_v53, %v1021_v20  ;;  %v1705_v61 = vpop.f32.mrf.mxu0  ;;  %v1344_v32 = vpop.f32.mrf.mxu3 }
 0x1dc   : > { %v4547_v52 = vadd.f32 %v1703_v42, %v1382_v24  ;;  %v4566_v24 = vld [vmem:[%s3895_s11 + $0x58] sm:$0xff] }
 0x1df   : > { %v975_v33 = vpop.f32.mrf.mxu2 }
 0x1e0   : > { %v1022_v53 = vadd.f32 %v975_v33, %v776_v28  ;;  %v778_v49 = vpop.f32.mrf.mxu1  ;;  %v2444_v28 = vshrl.u32 %v4566_v24, 16  ;;  %v2447_v33 = vshll.u32 %v4566_v24, 16 }
 0x1e1   : > { %v779_v56 = vadd.f32 %v778_v49, %v4986_v19 }
 0x1e2   : > { %v1383_v42 = vadd.f32 %v1336_v58, %v1022_v53  ;;  %v1708_v40 = vpop.f32.mrf.mxu0  ;;  %v1346_v20 = vpop.f32.mrf.mxu3  ;;  %v2442_v58 = vsel %vm2362_vm5, %v2432_v57, %v2441_v41  ;;  %v4987_v53 = vld [vmem:[#allocation6_spill] sm:$0xff]  ;;  %v2745_v57 = vrot.slane %v4522_v63, 3 }
 0x1e3   : > { %3433 = vmatmul.msk.bf16.gmra.mxu1 %vm497_vm2, %v1778_v5 }
 0x1e4   : > { %3520 = vmatmul.msk.bf16.gmra.mxu2 %vm497_vm2, %v2139_v45  ;;  %v4560_v55 = vadd.f32 %v1705_v61, %v1383_v42  ;;  %v3705_v61 = vld [vmem:[%s3895_s11 + $0x40] sm:$0xff]  ;;  %v2141_v42 = vsel %vm1765_vm6, %v2138_v36, %v2140_v39 }
 0x1e5   : > { %3558 = vmatmul.msk.bf16.gmra.mxu0 %vm497_vm2, %v2744_v6  ;;  %v1779_v13 = vrot.slane %v3705_v61, 2  ;;  %v2449_v6 = vrot.slane %v2447_v33, 3 }
 0x1e6   : > { %3541 = vmatmul.msk.bf16.gmra.mxu3 %vm497_vm2, %v2442_v58 }
 0x1e7   : > { %v978_v47 = vpop.f32.mrf.mxu2  ;;  %v1780_v22 = vsel %vm1765_vm6, %v1777_v54, %v1779_v13  ;;  %v4988_v54 = vld [vmem:[#allocation7_spill] sm:$0xff] }
 0x1e8   : > { %v1023_v27 = vadd.f32 %v978_v47, %v779_v56  ;;  %v780_v7 = vpop.f32.mrf.mxu1  ;;  %v2746_v47 = vsel %vm2731_vm7, %v2743_v4, %v2745_v57 }
 0x1e9   : > { %v781_v49 = vadd.f32 %v780_v7, %v4987_v53 }
 0x1ea   : > { %v1384_v2 = vadd.f32 %v1339_v16, %v1023_v27  ;;  %v1710_v62 = vpop.f32.mrf.mxu0  ;;  %v1349_v45 = vpop.f32.mrf.mxu3 }
 0x1ec   : > { %v4569_v3 = vadd.f32 %v1708_v40, %v1384_v2  ;;  %v2446_v40 = vrot.slane %v2444_v28, 2  ;;  %v4588_v28 = vld [vmem:[%s3895_s11 + $0x60] sm:$0xff] }
 0x1ee   : > { %v2450_v27 = vor.u32 %v2449_v6, %v2446_v40 }
 0x1ef   : > { %v980_v5 = vpop.f32.mrf.mxu2 }
 0x1f0   : > { %v1024_v16 = vadd.f32 %v980_v5, %v781_v49  ;;  %v783_v48 = vpop.f32.mrf.mxu1  ;;  %v2142_v5 = vrot.slane %v4544_v1, 2 }
 0x1f1   : > { %v784_v7 = vadd.f32 %v783_v48, %v4988_v54  ;;  %v2456_v48 = vshll.u32 %v4588_v28, 16 }
 0x1f2   : > { %v1385_v19 = vadd.f32 %v1341_v51, %v1024_v16  ;;  %v1713_v56 = vpop.f32.mrf.mxu0  ;;  %v1351_v58 = vpop.f32.mrf.mxu3  ;;  %v2451_v51 = vsel %vm2362_vm5, %v2441_v41, %v2450_v27  ;;  %v2453_v16 = vshrl.u32 %v4588_v28, 16  ;;  %v2747_v41 = vrot.slane %v4544_v1, 3 }
 0x1f3   : > { %3434 = vmatmul.msk.bf16.gmra.mxu1 %vm497_vm2, %v1780_v22  ;;  %v4989_v22 = vld [vmem:[#allocation8_spill] sm:$0xff] }
 0x1f4   : > { %3521 = vmatmul.msk.bf16.gmra.mxu2 %vm497_vm2, %v2141_v42  ;;  %v4582_v63 = vadd.f32 %v1710_v62, %v1385_v19  ;;  %v3706_v62 = vld [vmem:[%s3895_s11 + $0x48] sm:$0xff]  ;;  %v2455_v54 = vrot.slane %v2453_v16, 2 }
 0x1f5   : > { %3559 = vmatmul.msk.bf16.gmra.mxu0 %vm497_vm2, %v2746_v47  ;;  %v1781_v49 = vrot.slane %v3706_v62, 2 }
 0x1f6   : > { %3542 = vmatmul.msk.bf16.gmra.mxu3 %vm497_vm2, %v2451_v51  ;;  %v2748_v51 = vsel %vm2731_vm7, %v2745_v57, %v2747_v41  ;;  %v4612_v57 = vld [vmem:[%s3895_s11 + $0x68] sm:$0xff] }
 0x1f7   : > { %v983_v36 = vpop.f32.mrf.mxu2  ;;  %v1782_v47 = vsel %vm1765_vm6, %v1779_v13, %v1781_v49  ;;  %v4990_v13 = vld [vmem:[#allocation9_spill] sm:$0xff] }
 0x1f8   : > { %v1025_v2 = vadd.f32 %v983_v36, %v784_v7  ;;  %v785_v61 = vpop.f32.mrf.mxu1  ;;  %v2458_v7 = vrot.slane %v2456_v48, 3 }
 0x1f9   : > { %v786_v42 = vadd.f32 %v785_v61, %v4989_v22 }
 0x1fa   : > { %v1386_v4 = vadd.f32 %v1344_v32, %v1025_v2  ;;  %v1715_v33 = vpop.f32.mrf.mxu0  ;;  %v2599_v6 = vpop.f32.mrf.mxu3  ;;  %v2459_v61 = vor.u32 %v2458_v7, %v2455_v54  ;;  %v4991_v54 = vld [vmem:[#allocation10_spill] sm:$0xff] }
 0x1fc   : > { %v4591_v53 = vadd.f32 %v1713_v56, %v1386_v4  ;;  %v2143_v56 = vsel %vm1765_vm6, %v2140_v39, %v2142_v5  ;;  %v2460_v48 = vsel %vm2362_vm5, %v2450_v27, %v2459_v61  ;;  %v2749_v27 = vrot.slane %v4566_v24, 3 }
 0x1ff   : > { %v985_v40 = vpop.f32.mrf.mxu2 }
 0x200   : > { %v1026_v32 = vadd.f32 %v985_v40, %v786_v42  ;;  %v788_v19 = vpop.f32.mrf.mxu1  ;;  %v3707_v40 = vld [vmem:[%s3895_s11 + $0x50] sm:$0xff] }
 0x201   : > { %v789_v4 = vadd.f32 %v788_v19, %v4990_v13  ;;  %v2462_v19 = vshrl.u32 %v4612_v57, 16 }
 0x202   : > { %v1387_v36 = vadd.f32 %v1346_v20, %v1026_v32  ;;  %v1718_v2 = vpop.f32.mrf.mxu0  ;;  %v4608_v62 = vpop.f32.mrf.mxu3  ;;  %v1783_v32 = vrot.slane %v3707_v40, 2  ;;  %v2750_v40 = vsel %vm2731_vm7, %v2747_v41, %v2749_v27 }
 0x203   : > { %3435 = vmatmul.msk.bf16.gmra.mxu1 %vm497_vm2, %v1782_v47  ;;  %v2144_v47 = vrot.slane %v4566_v24, 2 }
 0x204   : > { %3522 = vmatmul.msk.bf16.gmra.mxu2 %vm497_vm2, %v2143_v56  ;;  %v4604_v1 = vadd.f32 %v1715_v33, %v1387_v36  ;;  %v2465_v56 = vshll.u32 %v4612_v57, 16 }
 0x205   : > { %3560 = vmatmul.msk.bf16.gmra.mxu0 %vm497_vm2, %v2748_v51 }
 0x206   : > { %3543 = vmatmul.msk.bf16.gmra.mxu3 %vm497_vm2, %v2460_v48 }
 0x207   : > { %v988_v39 = vpop.f32.mrf.mxu2 }
 0x208   : > { %v1027_v16 = vadd.f32 %v988_v39, %v789_v4  ;;  %v790_v20 = vpop.f32.mrf.mxu1  ;;  %v2145_v4 = vsel %vm1765_vm6, %v2142_v5, %v2144_v47  ;;  %v2464_v39 = vrot.slane %v2462_v19, 2 }
 0x209   : > { %v791_v7 = vadd.f32 %v790_v20, %v4991_v54  ;;  %v4639_v54 = vld [vmem:[%s3895_s11 + $0x70] sm:$0xff] }
 0x20a   : > { %v1388_v22 = vadd.f32 %v1349_v45, %v1027_v16  ;;  %v1720_v42 = vpop.f32.mrf.mxu0  ;;  %v4623_v51 = vpop.f32.mrf.mxu3  ;;  %v2467_v16 = vrot.slane %v2465_v56, 3 }
 0x20c   : > { %v4615_v33 = vadd.f32 %v1718_v2, %v1388_v22  ;;  %v1784_v2 = vsel %vm1765_vm6, %v1781_v49, %v1783_v32  ;;  %v2468_v49 = vor.u32 %v2467_v16, %v2464_v39  ;;  %v2751_v16 = vrot.slane %v4588_v28, 3 }
 0x20e   : > { %v2469_v41 = vsel %vm2362_vm5, %v2459_v61, %v2468_v49  ;;  %v2471_v61 = vshrl.u32 %v4639_v54, 16 }
 0x20f   : > { %v990_v36 = vpop.f32.mrf.mxu2 }
 0x210   : > { %v1028_v45 = vadd.f32 %v990_v36, %v791_v7  ;;  %v1869_v13 = vpop.f32.mrf.mxu1 }
 0x211   : > { %v1959_v5 = vadd.f32 %v1869_v13, %v4232_v34 }
 0x212   : > { %v1389_v48 = vadd.f32 %v1351_v58, %v1028_v45  ;;  %v2835_v22 = vpop.f32.mrf.mxu0  ;;  %v4634_v19 = vpop.f32.mrf.mxu3  ;;  %v3708_v45 = vld [vmem:[%s3895_s11 + $0x58] sm:$0xff] }
 0x213   : > { %3436 = vmatmul.msk.bf16.gmra.mxu1 %vm497_vm2, %v1784_v2  ;;  %v1785_v13 = vrot.slane %v3708_v45, 2  ;;  %v2146_v2 = vrot.slane %v4588_v28, 2 }
 0x214   : > { %3523 = vmatmul.msk.bf16.gmra.mxu2 %vm497_vm2, %v2145_v4  ;;  %v4630_v24 = vadd.f32 %v1720_v42, %v1389_v48  ;;  %v4644_v42 = vld [vmem:[%s4966_s2] ss:$0 sm:$0xff]  ;;  %v2474_v4 = vshll.u32 %v4639_v54, 16 }
 0x215   : > { %3561 = vmatmul.msk.bf16.gmra.mxu0 %vm497_vm2, %v2750_v40 }
 0x216   : > { %3544 = vmatmul.msk.bf16.gmra.mxu3 %vm497_vm2, %v2469_v41  ;;  %v2147_v41 = vsel %vm1765_vm6, %v2144_v47, %v2146_v2  ;;  %v2476_v45 = vrot.slane %v2474_v4, 3 }
 0x217   : > { %v2230_v20 = vpop.f32.mrf.mxu2 }
 0x218   : > { %v2320_v58 = vadd.f32 %v2230_v20, %v1959_v5  ;;  %v1871_v56 = vpop.f32.mrf.mxu1 }
 0x219   : > { %v1960_v39 = vadd.f32 %v1871_v56, %v4242_v26  ;;  %v2752_v56 = vsel %vm2731_vm7, %v2749_v27, %v2751_v16 }
 0x21a   : > { %v2689_v7 = vadd.f32 %v2599_v6, %v2320_v58  ;;  %v2837_v36 = vpop.f32.mrf.mxu0  ;;  %v4656_v40 = vpop.f32.mrf.mxu3  ;;  %v1786_v58 = vsel %vm1765_vm6, %v1783_v32, %v1785_v13 }
 0x21c   : > { %v2925_v34 = vadd.f32 %v2835_v22, %v2689_v7  ;;  %v2473_v7 = vrot.slane %v2471_v61, 2 }
 0x21e   : > { %v2965_v6 = vadd.f32 %v4644_v42, %v2925_v34  ;;  %v2477_v32 = vor.u32 %v2476_v45, %v2473_v7 }
 0x21f   : > { %v2232_v48 = vpop.f32.mrf.mxu2 }
 0x220   : > { %v3001_v22 = vmax.f32 %v2965_v6, 0.0  ;;  %v2321_v5 = vadd.f32 %v2232_v48, %v1960_v39  ;;  %v1874_v20 = vpop.f32.mrf.mxu1  ;;  %v2478_v27 = vsel %vm2362_vm5, %v2468_v49, %v2477_v32 }
 0x221   : > { %v1961_v61 = vadd.f32 %v1874_v20, %v4248_v18  ;;  %v2148_v18 = vrot.slane %v4612_v57, 2 }
 0x222   : > { %3037 = vst [vmem:[%s4660_s9] sm:$0xff] %v3001_v22  ;;  %v2690_v26 = vadd.f32 %v4608_v62, %v2321_v5  ;;  %v2840_v28 = vpop.f32.mrf.mxu0  ;;  %v4670_v62 = vpop.f32.mrf.mxu3 }
 0x223   : > { %3437 = vmatmul.msk.bf16.gmra.mxu1 %vm497_vm2, %v1786_v58 }
 0x224   : > { %v2926_v34 = vadd.f32 %v2837_v36, %v2690_v26  ;;  %3524 = vmatmul.msk.bf16.gmra.mxu2 %vm497_vm2, %v2147_v41  ;;  %v4674_v36 = vld [vmem:[%s3895_s11 + $0x78] sm:$0xff]  ;;  %v3709_v41 = vld [vmem:[%s3895_s11 + $0x60] sm:$0xff] }
 0x225   : > { %3562 = vmatmul.msk.bf16.gmra.mxu0 %vm497_vm2, %v2752_v56  ;;  %v1787_v7 = vrot.slane %v3709_v41, 2  ;;  %v2480_v20 = vshrl.u32 %v4674_v36, 16  ;;  %v2483_v45 = vshll.u32 %v4674_v36, 16  ;;  %v2753_v56 = vrot.slane %v4612_v57, 3 }
 0x226   : > { %v2966_v47 = vadd.f32 %v4644_v42, %v2926_v34  ;;  %3545 = vmatmul.msk.bf16.gmra.mxu3 %vm497_vm2, %v2478_v27 }
 0x227   : > { %v2235_v4 = vpop.f32.mrf.mxu2  ;;  %v2485_v27 = vrot.slane %v2483_v45, 3 }
 0x228   : > { %v3002_v6 = vmax.f32 %v2966_v47, 0.0  ;;  %v2322_v39 = vadd.f32 %v2235_v4, %v1961_v61  ;;  %v1876_v48 = vpop.f32.mrf.mxu1  ;;  %v1788_v4 = vsel %vm1765_vm6, %v1785_v13, %v1787_v7 }
 0x229   : > { %v1962_v26 = vadd.f32 %v1876_v48, %v4258_v30  ;;  %v2754_v30 = vsel %vm2731_vm7, %v2751_v16, %v2753_v56 }
 0x22a   : > { %3038 = vst [vmem:[%s4660_s9 + $0x8] sm:$0xff] %v3002_v6  ;;  %v2691_v22 = vadd.f32 %v4623_v51, %v2322_v39  ;;  %v2842_v5 = vpop.f32.mrf.mxu0  ;;  %v4686_v34 = vpop.f32.mrf.mxu3  ;;  %v2149_v6 = vsel %vm1765_vm6, %v2146_v2, %v2148_v18  ;;  %v2482_v39 = vrot.slane %v2480_v20, 2 }
 0x22c   : > { %v2927_v58 = vadd.f32 %v2840_v28, %v2691_v22  ;;  %v2486_v13 = vor.u32 %v2485_v27, %v2482_v39  ;;  %v2755_v27 = vrot.slane %v4639_v54, 3 }
 0x22e   : > { %v2967_v49 = vadd.f32 %v4644_v42, %v2927_v58  ;;  %v2487_v16 = vsel %vm2362_vm5, %v2477_v32, %v2486_v13 }
 0x22f   : > { %v2237_v51 = vpop.f32.mrf.mxu2 }
 0x230   : > { %v3003_v28 = vmax.f32 %v2967_v49, 0.0  ;;  %v2323_v47 = vadd.f32 %v2237_v51, %v1962_v26  ;;  %v1879_v61 = vpop.f32.mrf.mxu1 }
 0x231   : > { %v1963_v48 = vadd.f32 %v1879_v61, %v4264_v60  ;;  %v2150_v60 = vrot.slane %v4639_v54, 2 }
 0x232   : > { %3039 = vst [vmem:[%s4660_s9 + $0x10] sm:$0xff] %v3003_v28  ;;  %v2692_v22 = vadd.f32 %v4634_v19, %v2323_v47  ;;  %v2845_v58 = vpop.f32.mrf.mxu0  ;;  %v4698_v19 = vpop.f32.mrf.mxu3  ;;  %v3710_v47 = vld [vmem:[%s3895_s11 + $0x68] sm:$0xff] }
 0x233   : > { %3438 = vmatmul.msk.bf16.gmra.mxu1 %vm497_vm2, %v1788_v4  ;;  %v1789_v4 = vrot.slane %v3710_v47, 2 }
 0x234   : > { %v2928_v57 = vadd.f32 %v2842_v5, %v2692_v22  ;;  %3525 = vmatmul.msk.bf16.gmra.mxu2 %vm497_vm2, %v2149_v6  ;;  %v4702_v5 = vld [vmem:[%s3895_s11 + $0x80] sm:$0xff] }
 0x235   : > { %3563 = vmatmul.msk.bf16.gmra.mxu0 %vm497_vm2, %v2754_v30  ;;  %v2489_v61 = vshrl.u32 %v4702_v5, 16  ;;  %v2492_v6 = vshll.u32 %v4702_v5, 16 }
 0x236   : > { %v2968_v2 = vadd.f32 %v4644_v42, %v2928_v57  ;;  %3546 = vmatmul.msk.bf16.gmra.mxu3 %vm497_vm2, %v2487_v16 }
 0x237   : > { %v2240_v41 = vpop.f32.mrf.mxu2 }
 0x238   : > { %v3004_v20 = vmax.f32 %v2968_v2, 0.0  ;;  %v2324_v45 = vadd.f32 %v2240_v41, %v1963_v48  ;;  %v1881_v49 = vpop.f32.mrf.mxu1  ;;  %v1790_v2 = vsel %vm1765_vm6, %v1787_v7, %v1789_v4  ;;  %v2151_v48 = vsel %vm1765_vm6, %v2148_v18, %v2150_v60 }
 0x239   : > { %v1964_v39 = vadd.f32 %v1881_v49, %v4274_v37  ;;  %v2491_v41 = vrot.slane %v2489_v61, 2  ;;  %v2756_v37 = vsel %vm2731_vm7, %v2753_v56, %v2755_v27 }
 0x23a   : > { %3040 = vst [vmem:[%s4660_s9 + $0x18] sm:$0xff] %v3004_v20  ;;  %v2693_v26 = vadd.f32 %v4656_v40, %v2324_v45  ;;  %v2847_v51 = vpop.f32.mrf.mxu0  ;;  %v4714_v22 = vpop.f32.mrf.mxu3  ;;  %v2494_v20 = vrot.slane %v2492_v6, 3 }
 0x23c   : > { %v2929_v28 = vadd.f32 %v2845_v58, %v2693_v26  ;;  %v2495_v7 = vor.u32 %v2494_v20, %v2491_v41 }
 0x23e   : > { %v2969_v32 = vadd.f32 %v4644_v42, %v2929_v28  ;;  %v2496_v56 = vsel %vm2362_vm5, %v2486_v13, %v2495_v7 }
 0x23f   : > { %v2242_v40 = vpop.f32.mrf.mxu2 }
 0x240   : > { %v3005_v58 = vmax.f32 %v2969_v32, 0.0  ;;  %v2325_v30 = vadd.f32 %v2242_v40, %v1964_v39  ;;  %v1884_v57 = vpop.f32.mrf.mxu1  ;;  %v3711_v40 = vld [vmem:[%s3895_s11 + $0x70] sm:$0xff] }
 0x241   : > { %v1965_v49 = vadd.f32 %v1884_v57, %v4280_v10  ;;  %v2152_v10 = vrot.slane %v4674_v36, 2 }
 0x242   : > { %3041 = vst [vmem:[%s4660_s9 + $0x20] sm:$0xff] %v3005_v58  ;;  %v2694_v45 = vadd.f32 %v4670_v62, %v2325_v30  ;;  %v2850_v16 = vpop.f32.mrf.mxu0  ;;  %v4726_v62 = vpop.f32.mrf.mxu3  ;;  %v1791_v58 = vrot.slane %v3711_v40, 2 }
 0x243   : > { %3439 = vmatmul.msk.bf16.gmra.mxu1 %vm497_vm2, %v1790_v2 }
 0x244   : > { %v2930_v54 = vadd.f32 %v2847_v51, %v2694_v45  ;;  %3526 = vmatmul.msk.bf16.gmra.mxu2 %vm497_vm2, %v2151_v48  ;;  %v4730_v51 = vld [vmem:[%s3895_s11 + $0x88] sm:$0xff]  ;;  %v2757_v48 = vrot.slane %v4674_v36, 3 }
 0x245   : > { %3564 = vmatmul.msk.bf16.gmra.mxu0 %vm497_vm2, %v2756_v37  ;;  %v2498_v30 = vshrl.u32 %v4730_v51, 16  ;;  %v2501_v57 = vshll.u32 %v4730_v51, 16  ;;  %v1792_v37 = vsel %vm1765_vm6, %v1789_v4, %v1791_v58 }
 0x246   : > { %v2970_v18 = vadd.f32 %v4644_v42, %v2930_v54  ;;  %3547 = vmatmul.msk.bf16.gmra.mxu3 %vm497_vm2, %v2496_v56  ;;  %v2153_v54 = vsel %vm1765_vm6, %v2150_v60, %v2152_v10 }
 0x247   : > { %v2245_v26 = vpop.f32.mrf.mxu2 }
 0x248   : > { %v3006_v28 = vmax.f32 %v2970_v18, 0.0  ;;  %v2326_v47 = vadd.f32 %v2245_v26, %v1965_v49  ;;  %v1886_v61 = vpop.f32.mrf.mxu1  ;;  %v2500_v18 = vrot.slane %v2498_v30, 2  ;;  %v2503_v49 = vrot.slane %v2501_v57, 3 }
 0x249   : > { %v1966_v2 = vadd.f32 %v1886_v61, %v4290_v0  ;;  %v2758_v0 = vsel %vm2731_vm7, %v2755_v27, %v2757_v48 }
 0x24a   : > { %3042 = vst [vmem:[%s4660_s9 + $0x28] sm:$0xff] %v3006_v28  ;;  %v2695_v6 = vadd.f32 %v4686_v34, %v2326_v47  ;;  %v2852_v32 = vpop.f32.mrf.mxu0  ;;  %v4742_v41 = vpop.f32.mrf.mxu3  ;;  %v2504_v4 = vor.u32 %v2503_v49, %v2500_v18 }
 0x24c   : > { %v2931_v39 = vadd.f32 %v2850_v16, %v2695_v6  ;;  %v2505_v27 = vsel %vm2362_vm5, %v2495_v7, %v2504_v4 }
 0x24e   : > { %v2971_v13 = vadd.f32 %v4644_v42, %v2931_v39 }
 0x24f   : > { %v2247_v34 = vpop.f32.mrf.mxu2 }
 0x250   : > { %v3007_v20 = vmax.f32 %v2971_v13, 0.0  ;;  %v2327_v45 = vadd.f32 %v2247_v34, %v1966_v2  ;;  %v1889_v16 = vpop.f32.mrf.mxu1  ;;  %v3712_v13 = vld [vmem:[%s3895_s11 + $0x78] sm:$0xff] }
 0x251   : > { %v1967_v47 = vadd.f32 %v1889_v16, %v4296_v11  ;;  %v1793_v2 = vrot.slane %v3712_v13, 2  ;;  %v2154_v11 = vrot.slane %v4702_v5, 2  ;;  %v2759_v16 = vrot.slane %v4702_v5, 3 }
 0x252   : > { %3043 = vst [vmem:[%s4660_s9 + $0x30] sm:$0xff] %v3007_v20  ;;  %v2696_v26 = vadd.f32 %v4698_v19, %v2327_v45  ;;  %v2855_v28 = vpop.f32.mrf.mxu0  ;;  %v4754_v19 = vpop.f32.mrf.mxu3 }
 0x253   : > { %3440 = vmatmul.msk.bf16.gmra.mxu1 %vm497_vm2, %v1792_v37 }
 0x254   : > { %v2932_v36 = vadd.f32 %v2852_v32, %v2696_v26  ;;  %3527 = vmatmul.msk.bf16.gmra.mxu2 %vm497_vm2, %v2153_v54  ;;  %v4758_v32 = vld [vmem:[%s3895_s11 + $0x90] sm:$0xff]  ;;  %v1794_v26 = vsel %vm1765_vm6, %v1791_v58, %v1793_v2 }
 0x255   : > { %3565 = vmatmul.msk.bf16.gmra.mxu0 %vm497_vm2, %v2758_v0  ;;  %v2507_v34 = vshrl.u32 %v4758_v32, 16  ;;  %v2510_v20 = vshll.u32 %v4758_v32, 16 }
 0x256   : > { %v2972_v60 = vadd.f32 %v4644_v42, %v2932_v36  ;;  %3548 = vmatmul.msk.bf16.gmra.mxu3 %vm497_vm2, %v2505_v27 }
 0x257   : > { %v2250_v61 = vpop.f32.mrf.mxu2  ;;  %v2509_v0 = vrot.slane %v2507_v34, 2  ;;  %v2512_v36 = vrot.slane %v2510_v20, 3  ;;  %v3713_v34 = vld [vmem:[%s3895_s11 + $0x80] sm:$0xff] }
 0x258   : > { %v3008_v56 = vmax.f32 %v2972_v60, 0.0  ;;  %v2328_v6 = vadd.f32 %v2250_v61, %v1967_v47  ;;  %v1891_v39 = vpop.f32.mrf.mxu1  ;;  %v1795_v20 = vrot.slane %v3713_v34, 2 }
 0x259   : > { %v1968_v45 = vadd.f32 %v1891_v39, %v4306_v17  ;;  %v2760_v17 = vsel %vm2731_vm7, %v2757_v48, %v2759_v16  ;;  %v2513_v58 = vor.u32 %v2512_v36, %v2509_v0 }
 0x25a   : > { %3044 = vst [vmem:[%s4660_s9 + $0x38] sm:$0xff] %v3008_v56  ;;  %v2697_v40 = vadd.f32 %v4714_v22, %v2328_v6  ;;  %v2857_v30 = vpop.f32.mrf.mxu0  ;;  %v4770_v37 = vpop.f32.mrf.mxu3  ;;  %v1796_v0 = vsel %vm1765_vm6, %v1793_v2, %v1795_v20 }
 0x25b   : > { %v2514_v48 = vsel %vm2362_vm5, %v2504_v4, %v2513_v58 }
 0x25c   : > { %v2933_v57 = vadd.f32 %v2855_v28, %v2697_v40  ;;  %v2155_v28 = vsel %vm1765_vm6, %v2152_v10, %v2154_v11  ;;  %v4786_v40 = vld [vmem:[%s3895_s11 + $0x98] sm:$0xff] }
 0x25e   : > { %v2973_v7 = vadd.f32 %v4644_v42, %v2933_v57 }
 0x25f   : > { %v2252_v22 = vpop.f32.mrf.mxu2 }
 0x260   : > { %v3009_v54 = vmax.f32 %v2973_v7, 0.0  ;;  %v2329_v18 = vadd.f32 %v2252_v22, %v1968_v45  ;;  %v1894_v49 = vpop.f32.mrf.mxu1  ;;  %v2516_v7 = vshrl.u32 %v4786_v40, 16  ;;  %v2519_v45 = vshll.u32 %v4786_v40, 16 }
 0x261   : > { %v1969_v61 = vadd.f32 %v1894_v49, %v4312_v38  ;;  %v2156_v38 = vrot.slane %v4730_v51, 2 }
 0x262   : > { %3045 = vst [vmem:[%s4660_s9 + $0x40] sm:$0xff] %v3009_v54  ;;  %v2698_v60 = vadd.f32 %v4726_v62, %v2329_v18  ;;  %v2860_v47 = vpop.f32.mrf.mxu0  ;;  %v4782_v62 = vpop.f32.mrf.mxu3 }
 0x263   : > { %3441 = vmatmul.msk.bf16.gmra.mxu1 %vm497_vm2, %v1794_v26  ;;  %v2157_v36 = vsel %vm1765_vm6, %v2154_v11, %v2156_v38 }
 0x264   : > { %v2934_v5 = vadd.f32 %v2857_v30, %v2698_v60  ;;  %3528 = vmatmul.msk.bf16.gmra.mxu2 %vm497_vm2, %v2155_v28  ;;  %v2518_v60 = vrot.slane %v2516_v7, 2  ;;  %v3714_v7 = vld [vmem:[%s3895_s11 + $0x88] sm:$0xff] }
 0x265   : > { %3566 = vmatmul.msk.bf16.gmra.mxu0 %vm497_vm2, %v2760_v17 }
 0x266   : > { %v2974_v10 = vadd.f32 %v4644_v42, %v2934_v5  ;;  %3549 = vmatmul.msk.bf16.gmra.mxu3 %vm497_vm2, %v2514_v48 }
 0x267   : > { %v2255_v56 = vpop.f32.mrf.mxu2 }
 0x268   : > { %v3010_v6 = vmax.f32 %v2974_v10, 0.0  ;;  %v2330_v39 = vadd.f32 %v2255_v56, %v1969_v61  ;;  %v1896_v27 = vpop.f32.mrf.mxu1  ;;  %v2356_v10 = vld [vmem:[%s3895_s11 + $0xa0] sm:$0x7] }
 0x269   : > { %v1970_v22 = vadd.f32 %v1896_v27, %v4322_v31  ;;  %v2360_v11 = vunpack.c.l.b16 %v2356_v10 }
 0x26a   : > { %3046 = vst [vmem:[%s4660_s9 + $0x48] sm:$0xff] %v3010_v6  ;;  %v2699_v30 = vadd.f32 %v4742_v41, %v2330_v39  ;;  %v2862_v57 = vpop.f32.mrf.mxu0  ;;  %v2761_v41 = vrot.slane %v4730_v51, 3  ;;  %v4798_v18 = vpop.f32.mrf.mxu3 }
 0x26c   : > { %v2935_v13 = vadd.f32 %v2860_v47, %v2699_v30  ;;  %v2521_v47 = vrot.slane %v2519_v45, 3  ;;  %v2762_v31 = vsel %vm2731_vm7, %v2759_v16, %v2761_v41  ;;  %v4814_v30 = vpack.c.b16 %v2360_v11, %v2360_v11 }
 0x26d   : > { %v1797_v45 = vrot.slane %v3714_v7, 2 }
 0x26e   : > { %v2975_v4 = vadd.f32 %v4644_v42, %v2935_v13  ;;  %v2522_v2 = vor.u32 %v2521_v47, %v2518_v60 }
 0x26f   : > { %v2257_v54 = vpop.f32.mrf.mxu2  ;;  %v1798_v47 = vsel %vm1765_vm6, %v1795_v20, %v1797_v45 }
 0x270   : > { %v3011_v49 = vmax.f32 %v2975_v4, 0.0  ;;  %v2331_v26 = vadd.f32 %v2257_v54, %v1970_v22  ;;  %v1899_v28 = vpop.f32.mrf.mxu1  ;;  %v2523_v48 = vsel %vm2362_vm5, %v2513_v58, %v2522_v2  ;;  %v2525_v4 = vshrl.u32 %v4814_v30, 16  ;;  %v4992_v54 = vld [vmem:[#allocation13_spill] sm:$0xff] }
 0x271   : > { %v1971_v56 = vadd.f32 %v1899_v28, %v4331_v35  ;;  %v2158_v35 = vrot.slane %v4758_v32, 2  ;;  %v2528_v22 = vshll.u32 %v4814_v30, 16 }
 0x272   : > { %3047 = vst [vmem:[%s4660_s9 + $0x50] sm:$0xff] %v3011_v49  ;;  %v2700_v17 = vadd.f32 %v4754_v19, %v2331_v26  ;;  %v2865_v5 = vpop.f32.mrf.mxu0  ;;  %v4811_v6 = vpop.f32.mrf.mxu3  ;;  %v2763_v26 = vrot.slane %v4758_v32, 3 }
 0x273   : > { %3442 = vmatmul.msk.bf16.gmra.mxu1 %vm497_vm2, %v1796_v0 }
 0x274   : > { %v2936_v51 = vadd.f32 %v2862_v57, %v2700_v17  ;;  %3529 = vmatmul.msk.bf16.gmra.mxu2 %vm497_vm2, %v2157_v36  ;;  %v2159_v17 = vsel %vm1765_vm6, %v2156_v38, %v2158_v35  ;;  %v2764_v11 = vsel %vm2731_vm7, %v2761_v41, %v2763_v26  ;;  %v4993_v38 = vld [vmem:[#allocation14_spill] sm:$0xff] }
 0x275   : > { %3567 = vmatmul.msk.bf16.gmra.mxu0 %vm497_vm2, %v2762_v31  ;;  %v2530_v31 = vrot.slane %v2528_v22, 3 }
 0x276   : > { %v2976_v61 = vadd.f32 %v4644_v42, %v2936_v51  ;;  %3550 = vmatmul.msk.bf16.gmra.mxu3 %vm497_vm2, %v2523_v48 }
 0x277   : > { %v2260_v19 = vpop.f32.mrf.mxu2 }
 0x278   : > { %v3012_v16 = vmax.f32 %v2976_v61, 0.0  ;;  %v2332_v39 = vadd.f32 %v2260_v19, %v1971_v56  ;;  %v1901_v27 = vpop.f32.mrf.mxu1 }
 0x279   : > { %v1972_v49 = vadd.f32 %v1901_v27, %v4992_v54  ;;  %v2765_v54 = vrot.slane %v4786_v40, 3 }
 0x27a   : > { %3048 = vst [vmem:[%s4660_s9 + $0x58] sm:$0xff] %v3012_v16  ;;  %v2701_v57 = vadd.f32 %v4770_v37, %v2332_v39  ;;  %v2867_v13 = vpop.f32.mrf.mxu0  ;;  %v2639_v28 = vpop.f32.mrf.mxu3 }
 0x27c   : > { %v2937_v34 = vadd.f32 %v2865_v5, %v2701_v57  ;;  %v2527_v5 = vrot.slane %v2525_v4, 2  ;;  %v2160_v4 = vrot.slane %v4786_v40, 2 }
 0x27e   : > { %v2977_v58 = vadd.f32 %v4644_v42, %v2937_v34  ;;  %v2531_v32 = vor.u32 %v2530_v31, %v2527_v5  ;;  %v3715_v34 = vld [vmem:[%s3895_s11 + $0x90] sm:$0xff]  ;;  %v2766_v5 = vsel %vm2731_vm7, %v2763_v26, %v2765_v54  ;;  %v2031_v31 = vld [vmem:[%s3895_s11 + $0xa0] sm:$0x3] }
 0x27f   : > { %v2262_v37 = vpop.f32.mrf.mxu2  ;;  %v1799_v7 = vrot.slane %v3715_v34, 2  ;;  %v2107_v40 = vunpack.c.l.b16 %v2031_v31 }
 0x280   : > { %v3013_v0 = vmax.f32 %v2977_v58, 0.0  ;;  %v2333_v36 = vadd.f32 %v2262_v37, %v1972_v49  ;;  %v1904_v60 = vpop.f32.mrf.mxu1  ;;  %v2532_v41 = vsel %vm2362_vm5, %v2522_v2, %v2531_v32 }
 0x281   : > { %v1973_v56 = vadd.f32 %v1904_v60, %v4993_v38  ;;  %v2161_v60 = vsel %vm1765_vm6, %v2158_v35, %v2160_v4  ;;  %v2126_v32 = vpack.c.b16 %v2107_v40, %v2107_v40 }
 0x282   : > { %3049 = vst [vmem:[%s4660_s9 + $0x60] sm:$0xff] %v3013_v0  ;;  %v2702_v10 = vadd.f32 %v4782_v62, %v2333_v36  ;;  %v2870_v51 = vpop.f32.mrf.mxu0  ;;  %v2641_v16 = vpop.f32.mrf.mxu3  ;;  %v1800_v36 = vsel %vm1765_vm6, %v1797_v45, %v1799_v7 }
 0x283   : > { %3443 = vmatmul.msk.bf16.gmra.mxu1 %vm497_vm2, %v1798_v47 }
 0x284   : > { %v2938_v61 = vadd.f32 %v2867_v13, %v2702_v10  ;;  %3530 = vmatmul.msk.bf16.gmra.mxu2 %vm497_vm2, %v2159_v17 }
 0x285   : > { %3568 = vmatmul.msk.bf16.gmra.mxu0 %vm497_vm2, %v2764_v11 }
 0x286   : > { %v2978_v20 = vadd.f32 %v4644_v42, %v2938_v61  ;;  %3551 = vmatmul.msk.bf16.gmra.mxu3 %vm497_vm2, %v2532_v41 }
 0x287   : > { %v2265_v19 = vpop.f32.mrf.mxu2 }
 0x288   : > { %v3014_v62 = vmax.f32 %v2978_v20, 0.0  ;;  %v2334_v39 = vadd.f32 %v2265_v19, %v1973_v56  ;;  %v1906_v27 = vpop.f32.mrf.mxu1  ;;  %v1801_v56 = vrot.slane %v4382_v12, 2  ;;  %v2162_v19 = vrot.slane %v2126_v32, 2 }
 0x289   : > { %v1974_v58 = vadd.f32 %v1906_v27, %v4387_v44 }
 0x28a   : > { %3050 = vst [vmem:[%s4660_s9 + $0x68] sm:$0xff] %v3014_v62  ;;  %v2703_v48 = vadd.f32 %v4798_v18, %v2334_v39  ;;  %v2872_v57 = vpop.f32.mrf.mxu0  ;;  %v2644_v49 = vpop.f32.mrf.mxu3  ;;  %v1802_v34 = vsel %vm1765_vm6, %v1799_v7, %v1801_v56 }
 0x28c   : > { %v2939_v13 = vadd.f32 %v2870_v51, %v2703_v48 }
 0x28e   : > { %v2979_v22 = vadd.f32 %v4644_v42, %v2939_v13 }
 0x28f   : > { %v2267_v2 = vpop.f32.mrf.mxu2 }
 0x290   : > { %v3015_v37 = vmax.f32 %v2979_v22, 0.0  ;;  %v2335_v18 = vadd.f32 %v2267_v2, %v1974_v58  ;;  %v1909_v0 = vpop.f32.mrf.mxu1 }
 0x291   : > { %v1975_v35 = vadd.f32 %v1909_v0, %v4401_v9  ;;  %v2767_v9 = vrot.slane %v4814_v30, 3 }
 0x292   : > { %3051 = vst [vmem:[%s4660_s9 + $0x70] sm:$0xff] %v3015_v37  ;;  %v2704_v47 = vadd.f32 %v4811_v6, %v2335_v18  ;;  %v2875_v17 = vpop.f32.mrf.mxu0  ;;  %v2646_v51 = vpop.f32.mrf.mxu3 }
 0x293   : > { %3444 = vmatmul.msk.bf16.gmra.mxu1 %vm497_vm2, %v1800_v36  ;;  %v2768_v58 = vsel %vm2731_vm7, %v2765_v54, %v2767_v9 }
 0x294   : > { %v2940_v44 = vadd.f32 %v2872_v57, %v2704_v47  ;;  %3531 = vmatmul.msk.bf16.gmra.mxu2 %vm497_vm2, %v2161_v60 }
 0x295   : > { %3569 = vmatmul.msk.bf16.gmra.mxu0 %vm497_vm2, %v2766_v5 }
 0x296   : > { %v2980_v45 = vadd.f32 %v4644_v42, %v2940_v44 }
 0x297   : > { %v2270_v10 = vpop.f32.mrf.mxu2 }
 0x298   : > { %v3016_v6 = vmax.f32 %v2980_v45, 0.0  ;;  %v2336_v11 = vadd.f32 %v2270_v10, %v1975_v35  ;;  %v1911_v61 = vpop.f32.mrf.mxu1 }
 0x299   : > { %v1976_v39 = vadd.f32 %v1911_v61, %v4417_v46 }
 0x29a   : > { %3052 = vst [vmem:[%s4660_s9 + $0x78] sm:$0xff] %v3016_v6  ;;  %v2705_v26 = vadd.f32 %v2639_v28, %v2336_v11  ;;  %v2877_v20 = vpop.f32.mrf.mxu0  ;;  %v2649_v41 = vpop.f32.mrf.mxu3  ;;  %v2163_v28 = vsel %vm1765_vm6, %v2160_v4, %v2162_v19 }
 0x29c   : > { %v2941_v38 = vadd.f32 %v2875_v17, %v2705_v26 }
 0x29e   : > { %v2981_v62 = vadd.f32 %v4644_v42, %v2941_v38 }
 0x29f   : > { %v2272_v27 = vpop.f32.mrf.mxu2 }
 0x2a0   : > { %v3017_v48 = vmax.f32 %v2981_v62, 0.0  ;;  %v2337_v57 = vadd.f32 %v2272_v27, %v1976_v39  ;;  %v1914_v13 = vpop.f32.mrf.mxu1 }
 0x2a1   : > { %v1977_v30 = vadd.f32 %v1914_v13, %v4434_v14 }
 0x2a2   : > { %3053 = vst [vmem:[%s4660_s9 + $0x80] sm:$0xff] %v3017_v48  ;;  %v2706_v22 = vadd.f32 %v2641_v16, %v2337_v57  ;;  %v2880_v12 = vpop.f32.mrf.mxu0  ;;  %v2651_v4 = vpop.f32.mrf.mxu3 }
 0x2a3   : > { %3445 = vmatmul.msk.bf16.gmra.mxu1 %vm497_vm2, %v1802_v34 }
 0x2a4   : > { %v2942_v2 = vadd.f32 %v2877_v20, %v2706_v22  ;;  %3532 = vmatmul.msk.bf16.gmra.mxu2 %vm497_vm2, %v2163_v28 }
 0x2a5   : > { %3570 = vmatmul.msk.bf16.gmra.mxu0 %vm497_vm2, %v2768_v58 }
 0x2a6   : > { %v2982_v46 = vadd.f32 %v4644_v42, %v2942_v2 }
 0x2a7   : > { %v2275_v7 = vpop.f32.mrf.mxu2 }
 0x2a8   : > { %v3018_v37 = vmax.f32 %v2982_v46, 0.0  ;;  %v2338_v18 = vadd.f32 %v2275_v7, %v1977_v30  ;;  %v1916_v16 = vpop.f32.mrf.mxu1 }
 0x2a9   : > { %v1978_v47 = vadd.f32 %v1916_v16, %v4448_v21 }
 0x2aa   : > { %3054 = vst [vmem:[%s4660_s9 + $0x88] sm:$0xff] %v3018_v37  ;;  %v2707_v0 = vadd.f32 %v2644_v49, %v2338_v18  ;;  %v2882_v54 = vpop.f32.mrf.mxu0  ;;  %v2654_v5 = vpop.f32.mrf.mxu3 }
 0x2ac   : > { %v2943_v36 = vadd.f32 %v2880_v12, %v2707_v0 }
 0x2ae   : > { %v2983_v60 = vadd.f32 %v4644_v42, %v2943_v36 }
 0x2af   : > { %v2277_v17 = vpop.f32.mrf.mxu2 }
 0x2b0   : > { %v3019_v31 = vmax.f32 %v2983_v60, 0.0  ;;  %v2339_v44 = vadd.f32 %v2277_v17, %v1978_v47  ;;  %v1919_v14 = vpop.f32.mrf.mxu1 }
 0x2b1   : > { %v1979_v49 = vadd.f32 %v1919_v14, %v4458_v23 }
 0x2b2   : > { %3055 = vst [vmem:[%s4660_s9 + $0x90] sm:$0xff] %v3019_v31  ;;  %v2708_v40 = vadd.f32 %v2646_v51, %v2339_v44  ;;  %v2885_v45 = vpop.f32.mrf.mxu0  ;;  %v2656_v21 = vpop.f32.mrf.mxu3 }
 0x2b4   : > { %v2944_v35 = vadd.f32 %v2882_v54, %v2708_v40 }
 0x2b6   : > { %v2984_v10 = vadd.f32 %v4644_v42, %v2944_v35 }
 0x2b7   : > { %v2280_v6 = vpop.f32.mrf.mxu2 }
 0x2b8   : > { %v3020_v11 = vmax.f32 %v2984_v10, 0.0  ;;  %v2340_v61 = vadd.f32 %v2280_v6, %v1979_v49  ;;  %v1921_v32 = vpop.f32.mrf.mxu1 }
 0x2b9   : > { %v1980_v51 = vadd.f32 %v1921_v32, %v4472_v59 }
 0x2ba   : > { %3056 = vst [vmem:[%s4660_s9 + $0x98] sm:$0xff] %v3020_v11  ;;  %v2709_v26 = vadd.f32 %v2649_v41, %v2340_v61  ;;  %v2887_v20 = vpop.f32.mrf.mxu0  ;;  %v2659_v48 = vpop.f32.mrf.mxu3 }
 0x2bc   : > { %v2945_v38 = vadd.f32 %v2885_v45, %v2709_v26 }
 0x2be   : > { %v2985_v56 = vadd.f32 %v4644_v42, %v2945_v38 }
 0x2bf   : > { %v2282_v19 = vpop.f32.mrf.mxu2 }
 0x2c0   : > { %v3021_v62 = vmax.f32 %v2985_v56, 0.0  ;;  %v2341_v39 = vadd.f32 %v2282_v19, %v1980_v51  ;;  %v1924_v9 = vpop.f32.mrf.mxu1 }
 0x2c1   : > { %v1981_v41 = vadd.f32 %v1924_v9, %v4481_v43 }
 0x2c2   : > { %3057 = vst [vmem:[%s4660_s9 + $0xa0] sm:$0xff] %v3021_v62  ;;  %v2710_v23 = vadd.f32 %v2651_v4, %v2341_v39  ;;  %v2890_v27 = vpop.f32.mrf.mxu0  ;;  %v2661_v46 = vpop.f32.mrf.mxu3 }
 0x2c4   : > { %v2946_v57 = vadd.f32 %v2887_v20, %v2710_v23 }
 0x2c6   : > { %v2986_v13 = vadd.f32 %v4644_v42, %v2946_v57 }
 0x2c7   : > { %v2285_v34 = vpop.f32.mrf.mxu2 }
 0x2c8   : > { %v3022_v28 = vmax.f32 %v2986_v13, 0.0  ;;  %v2342_v22 = vadd.f32 %v2285_v34, %v1981_v41  ;;  %v1926_v12 = vpop.f32.mrf.mxu1 }
 0x2c9   : > { %v1982_v7 = vadd.f32 %v1926_v12, %v4494_v25 }
 0x2ca   : > { %3058 = vst [vmem:[%s4660_s9 + $0xa8] sm:$0xff] %v3022_v28  ;;  %v2711_v59 = vadd.f32 %v2654_v5, %v2342_v22  ;;  %v2892_v58 = vpop.f32.mrf.mxu0  ;;  %v2664_v17 = vpop.f32.mrf.mxu3 }
 0x2cc   : > { %v2947_v2 = vadd.f32 %v2890_v27, %v2711_v59 }
 0x2ce   : > { %v2987_v30 = vadd.f32 %v4644_v42, %v2947_v2 }
 0x2cf   : > { %v2287_v4 = vpop.f32.mrf.mxu2 }
 0x2d0   : > { %v3023_v37 = vmax.f32 %v2987_v30, 0.0  ;;  %v2343_v18 = vadd.f32 %v2287_v4, %v1982_v7  ;;  %v1929_v16 = vpop.f32.mrf.mxu1 }
 0x2d1   : > { %v1983_v60 = vadd.f32 %v1929_v16, %v4503_v8 }
 0x2d2   : > { %3059 = vst [vmem:[%s4660_s9 + $0xb0] sm:$0xff] %v3023_v37  ;;  %v2712_v43 = vadd.f32 %v2656_v21, %v2343_v18  ;;  %v2895_v0 = vpop.f32.mrf.mxu0  ;;  %v2666_v8 = vpop.f32.mrf.mxu3 }
 0x2d4   : > { %v2948_v54 = vadd.f32 %v2892_v58, %v2712_v43 }
 0x2d6   : > { %v2988_v36 = vadd.f32 %v4644_v42, %v2948_v54 }
 0x2d7   : > { %v2290_v47 = vpop.f32.mrf.mxu2 }
 0x2d8   : > { %v3024_v5 = vmax.f32 %v2988_v36, 0.0  ;;  %v2344_v31 = vadd.f32 %v2290_v47, %v1983_v60  ;;  %v1931_v44 = vpop.f32.mrf.mxu1 }
 0x2d9   : > { %v1984_v35 = vadd.f32 %v1931_v44, %v4516_v50 }
 0x2da   : > { %3060 = vst [vmem:[%s4660_s9 + $0xb8] sm:$0xff] %v3024_v5  ;;  %v2713_v25 = vadd.f32 %v2659_v48, %v2344_v31  ;;  %v2897_v14 = vpop.f32.mrf.mxu0  ;;  %v2669_v39 = vpop.f32.mrf.mxu3 }
 0x2dc   : > { %v2949_v40 = vadd.f32 %v2895_v0, %v2713_v25 }
 0x2de   : > { %v2989_v45 = vadd.f32 %v4644_v42, %v2949_v40 }
 0x2df   : > { %v2292_v10 = vpop.f32.mrf.mxu2 }
 0x2e0   : > { %v3025_v49 = vmax.f32 %v2989_v45, 0.0  ;;  %v2345_v6 = vadd.f32 %v2292_v10, %v1984_v35  ;;  %v1934_v11 = vpop.f32.mrf.mxu1 }
 0x2e1   : > { %v1985_v20 = vadd.f32 %v1934_v11, %v4525_v29 }
 0x2e2   : > { %3061 = vst [vmem:[%s4660_s9 + $0xc0] sm:$0xff] %v3025_v49  ;;  %v2714_v61 = vadd.f32 %v2661_v46, %v2345_v6  ;;  %v2900_v32 = vpop.f32.mrf.mxu0  ;;  %v2671_v22 = vpop.f32.mrf.mxu3 }
 0x2e4   : > { %v2950_v21 = vadd.f32 %v2897_v14, %v2714_v61 }
 0x2e6   : > { %v2990_v26 = vadd.f32 %v4644_v42, %v2950_v21 }
 0x2e7   : > { %v2295_v38 = vpop.f32.mrf.mxu2 }
 0x2e8   : > { %v3026_v56 = vmax.f32 %v2990_v26, 0.0  ;;  %v2346_v51 = vadd.f32 %v2295_v38, %v1985_v20  ;;  %v1936_v19 = vpop.f32.mrf.mxu1 }
 0x2e9   : > { %v1986_v27 = vadd.f32 %v1936_v19, %v4538_v15 }
 0x2ea   : > { %3062 = vst [vmem:[%s4660_s9 + $0xc8] sm:$0xff] %v3026_v56  ;;  %v2715_v50 = vadd.f32 %v2664_v17, %v2346_v51  ;;  %v2902_v62 = vpop.f32.mrf.mxu0  ;;  %v2674_v43 = vpop.f32.mrf.mxu3 }
 0x2ec   : > { %v2951_v9 = vadd.f32 %v2900_v32, %v2715_v50 }
 0x2ee   : > { %v2991_v23 = vadd.f32 %v4644_v42, %v2951_v9 }
 0x2ef   : > { %v2297_v48 = vpop.f32.mrf.mxu2 }
 0x2f0   : > { %v3027_v57 = vmax.f32 %v2991_v23, 0.0  ;;  %v2347_v13 = vadd.f32 %v2297_v48, %v1986_v27  ;;  %v1939_v41 = vpop.f32.mrf.mxu1 }
 0x2f1   : > { %v1987_v59 = vadd.f32 %v1939_v41, %v4547_v52 }
 0x2f2   : > { %3063 = vst [vmem:[%s4660_s9 + $0xd0] sm:$0xff] %v3027_v57  ;;  %v2716_v29 = vadd.f32 %v2666_v8, %v2347_v13  ;;  %v2905_v34 = vpop.f32.mrf.mxu0 }
 0x2f4   : > { %v2952_v28 = vadd.f32 %v2902_v62, %v2716_v29 }
 0x2f6   : > { %v2992_v12 = vadd.f32 %v4644_v42, %v2952_v28 }
 0x2f7   : > { %v2300_v58 = vpop.f32.mrf.mxu2 }
 0x2f8   : > { %v3028_v2 = vmax.f32 %v2992_v12, 0.0  ;;  %v2348_v46 = vadd.f32 %v2300_v58, %v1987_v59  ;;  %v1941_v30 = vpop.f32.mrf.mxu1 }
 0x2f9   : > { %v1988_v18 = vadd.f32 %v1941_v30, %v4560_v55  ;;  %v2676_v55 = vpop.f32.mrf.mxu3 }
 0x2fa   : > { %3064 = vst [vmem:[%s4660_s9 + $0xd8] sm:$0xff] %v3028_v2  ;;  %v2717_v15 = vadd.f32 %v2669_v39, %v2348_v46  ;;  %v2907_v7 = vpop.f32.mrf.mxu0 }
 0x2fc   : > { %v2953_v4 = vadd.f32 %v2905_v34, %v2717_v15  ;;  %v3716_v15 = vld [vmem:[%s4966_s2] ss:$0 sm:$0xff] }
 0x2fe   : > { %v2993_v37 = vadd.f32 %v4644_v42, %v2953_v4 }
 0x2ff   : > { %v2302_v16 = vpop.f32.mrf.mxu2 }
 0x300   : > { %v3029_v0 = vmax.f32 %v2993_v37, 0.0  ;;  %v2349_v54 = vadd.f32 %v2302_v16, %v1988_v18  ;;  %v1944_v36 = vpop.f32.mrf.mxu1 }
 0x301   : > { %v1989_v5 = vadd.f32 %v1944_v36, %v4569_v3  ;;  %v2679_v32 = vpop.f32.mrf.mxu3 }
 0x302   : > { %3065 = vst [vmem:[%s4660_s9 + $0xe0] sm:$0xff] %v3029_v0  ;;  %v2718_v52 = vadd.f32 %v2671_v22, %v2349_v54  ;;  %v2910_v60 = vpop.f32.mrf.mxu0 }
 0x304   : > { %v2954_v47 = vadd.f32 %v2907_v7, %v2718_v52 }
 0x306   : > { %v2994_v17 = vadd.f32 %v4644_v42, %v2954_v47 }
 0x307   : > { %v2305_v31 = vpop.f32.mrf.mxu2 }
 0x308   : > { %v3030_v44 = vmax.f32 %v2994_v17, 0.0  ;;  %v2350_v25 = vadd.f32 %v2305_v31, %v1989_v5  ;;  %v1946_v14 = vpop.f32.mrf.mxu1 }
 0x309   : > { %v1990_v49 = vadd.f32 %v1946_v14, %v4582_v63  ;;  %v2681_v39 = vpop.f32.mrf.mxu3 }
 0x30a   : > { %3066 = vst [vmem:[%s4660_s9 + $0xe8] sm:$0xff] %v3030_v44  ;;  %v2719_v40 = vadd.f32 %v2674_v43, %v2350_v25  ;;  %v2912_v45 = vpop.f32.mrf.mxu0 }
 0x30c   : > { %v2955_v35 = vadd.f32 %v2910_v60, %v2719_v40 }
 0x30e   : > { %v2995_v10 = vadd.f32 %v4644_v42, %v2955_v35 }
 0x30f   : > { %v2307_v6 = vpop.f32.mrf.mxu2 }
 0x310   : > { %v3031_v11 = vmax.f32 %v2995_v10, 0.0  ;;  %v2351_v8 = vadd.f32 %v2307_v6, %v1990_v49  ;;  %v1949_v61 = vpop.f32.mrf.mxu1 }
 0x311   : > { %v1991_v38 = vadd.f32 %v1949_v61, %v4591_v53  ;;  %v2684_v22 = vpop.f32.mrf.mxu3 }
 0x312   : > { %3067 = vst [vmem:[%s4660_s9 + $0xf0] sm:$0xff] %v3031_v11  ;;  %v2720_v3 = vadd.f32 %v2676_v55, %v2351_v8  ;;  %v2915_v26 = vpop.f32.mrf.mxu0 }
 0x314   : > { %v2956_v21 = vadd.f32 %v2912_v45, %v2720_v3 }
 0x316   : > { %v2996_v20 = vadd.f32 %v4644_v42, %v2956_v21 }
 0x317   : > { %v2310_v56 = vpop.f32.mrf.mxu2 }
 0x318   : > { %v3032_v51 = vmax.f32 %v2996_v20, 0.0  ;;  %v2352_v19 = vadd.f32 %v2310_v56, %v1991_v38  ;;  %v1951_v50 = vpop.f32.mrf.mxu1 }
 0x319   : > { %v1992_v23 = vadd.f32 %v1951_v50, %v4604_v1  ;;  %v2686_v18 = vpop.f32.mrf.mxu3 }
 0x31a   : > { %3068 = vst [vmem:[%s4660_s9 + $0xf8] sm:$0xff] %v3032_v51  ;;  %v2721_v63 = vadd.f32 %v2679_v32, %v2352_v19  ;;  %v2917_v27 = vpop.f32.mrf.mxu0 }
 0x31c   : > { %v2957_v62 = vadd.f32 %v2915_v26, %v2721_v63 }
 0x31e   : > { %v2997_v9 = vadd.f32 %v4644_v42, %v2957_v62 }
 0x31f   : > { %v2312_v48 = vpop.f32.mrf.mxu2 }
 0x320   : > { %v3033_v57 = vmax.f32 %v2997_v9, 0.0  ;;  %v2353_v13 = vadd.f32 %v2312_v48, %v1992_v23  ;;  %v1954_v53 = vpop.f32.mrf.mxu1 }
 0x321   : > { %v1993_v28 = vadd.f32 %v1954_v53, %v4615_v33 }
 0x322   : > { %3069 = vst [vmem:[%s4660_s9 + $0x100] sm:$0xff] %v3033_v57  ;;  %v2722_v41 = vadd.f32 %v2681_v39, %v2353_v13  ;;  %v2920_v1 = vpop.f32.mrf.mxu0 }
 0x324   : > { %v2958_v29 = vadd.f32 %v2917_v27, %v2722_v41 }
 0x326   : > { %v2998_v34 = vadd.f32 %v4644_v42, %v2958_v29 }
 0x327   : > { %v2315_v12 = vpop.f32.mrf.mxu2 }
 0x328   : > { %v3034_v59 = vmax.f32 %v2998_v34, 0.0  ;;  %v2354_v58 = vadd.f32 %v2315_v12, %v1993_v28  ;;  %v1956_v46 = vpop.f32.mrf.mxu1 }
 0x329   : > { %v1994_v42 = vadd.f32 %v1956_v46, %v4630_v24 }
 0x32a   : > { %3070 = vst [vmem:[%s4660_s9 + $0x108] sm:$0xff] %v3034_v59  ;;  %v2723_v2 = vadd.f32 %v2684_v22, %v2354_v58  ;;  %v2922_v43 = vpop.f32.mrf.mxu0 }
 0x32c   : > { %v2959_v30 = vadd.f32 %v2920_v1, %v2723_v2 }
 0x32e   : > { %v2999_v7 = vadd.f32 %v3716_v15, %v2959_v30 }
 0x32f   : > { %v2317_v33 = vpop.f32.mrf.mxu2 }
 0x330   : > { %v3035_v4 = vmax.f32 %v2999_v7, 0.0  ;;  %v2355_v37 = vadd.f32 %v2317_v33, %v1994_v42 }
 0x332   : > { %3071 = vst [vmem:[%s4660_s9 + $0x110] sm:$0xff] %v3035_v4  ;;  %v2724_v16 = vadd.f32 %v2686_v18, %v2355_v37 }
 0x334   : > { %v2960_v0 = vadd.f32 %v2922_v43, %v2724_v16 }
 0x336   : > { %v3000_v54 = vadd.f32 %v3716_v15, %v2960_v0 }
 0x338   : > { %v3036_v24 = vmax.f32 %v3000_v54, 0.0 }
 0x33a   : > { %3072 = vst [vmem:[%s4660_s9 + $0x118] sm:$0xff] %v3036_v24 }
 0x33b   : > { %3744 = shalt.err (!%p3741_p5)
}
 0x33c   : > { %s3797_s5 = smov 128   ;;  %s3798_s9 = smov 8  }
 0x33d   : > { %3638 = dma.vmem_to_hbm [thread:$0]  (%p3859_p4), %s3088_s15, 4608, %s3090_s26, %s3074_s27, %s3797_s5, %s3797_s5, %s3798_s9  }
 0x33e PF: > { %p3644_p6 = scmp.ge.s32.totalorder %s3795_s17, 2  ;;  %s3104_s10 = sand.u32 1, %s3775_s12  }
 0x33f   : > { %s3105_s11 = scalar_lea.sflag [#allocation3], %s3104_s10 }
 0x340   : > { %p3641_p7 = pnand %p3644_p6, %p3866_p8 }
 0x342   : > { %p3642_p9 = pneg %p3641_p7 }
 0x344   : > { %3770 = dma.done.wait (%p3642_p9), %s3105_s11, 4608  }
 0x345   : > { %3772 = vsyncadd (%p3642_p9), %s3105_s11, 4294962688  ;;  %s16_s17 = sadd.s32 1, %s3795_s17   ;;  %s4994_s12 = smov %s3779_s13 }
 0x346   : > { %p13_p10 = scmp.ge.s32.totalorder %s16_s17, 4   ;;  %s4995_s13 = smov %s3783_s14 }
 0x347   : > { %s4996_s14 = smov %s3872_s25  ;;  %s4997_s15 = smov %s3791_s16 }
 0x348   : > { %s4998_s16 = smov %s5000_s20  ;;  %15 = sbr.rel (!%p13_p10) target bundleno = 4 (0x4), region = 81 }
 0x34d   :  { %3111 = vsyncpa [#allocation3], 1 }
 0x34e   :  { %3113 = vsyncpa [#allocation3 + $0x1], 1 }

</bundles_post_ra>
